<compile_context>
chip_gen: v6e
topology: v6e:2x2x1
jax: 0.10.0
libtpu: 0.0.40
codegen_flags: <defaults>
</compile_context>

<pallas_src>
import functools
import math

import jax
import jax.numpy as jnp
from jax import lax
from jax.experimental import pallas as pl
from jax.experimental.pallas import tpu as pltpu

EPS = 1e-6
DEFAULT_ROW_TILE = 256


# ----------------------------- small helpers -----------------------------

def _round_up(x, mult):
    return (x + mult - 1) // mult * mult


def _choose_tile(n, row_tile):
    """Row tile (multiple of 8) and padded row count (multiple of the tile)."""
    tn = min(_round_up(max(row_tile, 8), 8), _round_up(n, 8))
    return tn, _round_up(n, tn)


def _nbytes(shape, dtype):
    return int(math.prod(shape)) * jnp.dtype(dtype).itemsize


def _vmem_limit(stream_bytes, const_bytes):
    """Explicit scoped-VMEM budget: double-buffered streaming blocks +
    single-buffered constants + slack, clamped to v7x's 64 MiB physical VMEM."""
    total = 2 * stream_bytes + const_bytes + (2 << 20)
    return int(min(max(total, 16 << 20), 64 << 20))


def _const_spec(shape, index_map):
    """Grid-invariant block: request single buffering (halves its VMEM cost)."""
    try:
        return pl.BlockSpec(shape, index_map, pipeline_mode=pl.Buffered(1))
    except (TypeError, AttributeError):      # older jax without pipeline_mode
        return pl.BlockSpec(shape, index_map)


# ----------------------------- fused kernels -----------------------------

def _encoder_kernel(x_ref, g_ref, wq_ref, bq_ref, bdenc_ref, gsum_ref,
                    expand_ref, c2t_ref, *rest, m, k, has_latent):
    """Fused per-level encoder.

    xq     = x @ (W_lse @ W_qh) + b'                   (fused lse+quant head)
    logit  = 2*t/s*<xq_g,cb_g> - t/s*|xq_g|^2 - t/s*|cb_g|^2
           = xq @ BD_enc' + (|xq_g|^2 per group) @ expand' + c2t'   (pre-scaled)
    sample = per-group one-hot(argmax(logit + gumbel)) (hard Gumbel-softmax)
    next   = x @ (W_lse @ W_lh) + b'' - sample @ BD_dec (residual, if latentHead)
    """
    if has_latent:
        wlh_ref, blh_ref, bddec_ref, sample_ref, logit_ref, next_ref = rest
    else:
        sample_ref, logit_ref = rest

    x = x_ref[...]                                                   # bf16 (tn, C)
    xq = jnp.dot(x, wq_ref[...], preferred_element_type=jnp.float32) + bq_ref[...]

    # logit from three pre-scaled terms; no per-element scalar multiplies.
    inter = jnp.dot(xq.astype(wq_ref.dtype), bdenc_ref[...],
                    preferred_element_type=jnp.float32)              # (tn, m*k)
    x2g = jnp.dot(xq * xq, gsum_ref[...],
                  preferred_element_type=jnp.float32)                # (tn, m)
    x2 = jnp.dot(x2g, expand_ref[...],
                 preferred_element_type=jnp.float32)                 # (tn, m*k)
    logit = inter + x2 + c2t_ref[...]
    logit_ref[...] = logit

    # Hard Gumbel-softmax: per-group one-hot of argmax(logit + g).
    # Static per-group slices -> O(m*k) work total (not O(m^2*k)).
    pert = logit + g_ref[...].astype(jnp.float32)
    tn = pert.shape[0]
    iota_k = lax.broadcasted_iota(jnp.int32, (tn, k), 1)
    pieces = []
    for mi in range(m):
        pg = pert[:, mi * k:(mi + 1) * k]
        mx = jnp.max(pg, axis=-1, keepdims=True)
        idx = jnp.min(jnp.where(pg == mx, iota_k, k), axis=-1, keepdims=True)
        pieces.append((iota_k == idx).astype(sample_ref.dtype))
    sample = jnp.concatenate(pieces, axis=-1)                         # (tn, m*k)
    sample_ref[...] = sample
    # permutationRate == 0.0 -> _permute is the identity.

    if has_latent:
        zlh = jnp.dot(x, wlh_ref[...],
                      preferred_element_type=jnp.float32) + blh_ref[...]
        deq = jnp.dot(sample, bddec_ref[...],
                      preferred_element_type=jnp.float32)
        next_ref[...] = (zlh - deq).astype(next_ref.dtype)


def _decoder_kernel(sample_ref, wdeq_ref, *rest, has_side, has_loss,
                    n_valid, tile_rows, inv_size):
    """Fused per-level decoder:
    out = sample @ (BD_dec @ W_dqh @ W_rh) [+ former @ (W_sh @ W_rh)] + bias,
    plus per-block MSE partial sums on the final level (padded rows masked)."""
    idx = 0
    if has_side:
        former_ref, wside_ref = rest[idx], rest[idx + 1]
        idx += 2
    bias_ref = rest[idx]
    idx += 1
    if has_loss:
        xgt_ref = rest[idx]
        idx += 1
    out_ref = rest[idx]
    idx += 1
    if has_loss:
        part_ref = rest[idx]

    acc = jnp.dot(sample_ref[...], wdeq_ref[...],
                  preferred_element_type=jnp.float32)
    if has_side:
        acc = acc + jnp.dot(former_ref[...], wside_ref[...],
                            preferred_element_type=jnp.float32)
    out = acc + bias_ref[...]
    out_ref[...] = out.astype(out_ref.dtype)

    if has_loss:
        # Per-block MSE partial, written as a broadcast (8, 128) tile: keeps the
        # store lane-dense and the grid "parallel" (no resident accumulator).
        diff = out - xgt_ref[...]
        row = pl.program_id(0) * tile_rows + lax.broadcasted_iota(
            jnp.int32, diff.shape, 0)
        valid = (row < n_valid).astype(jnp.float32)
        part = jnp.sum(diff * diff * valid) * inv_size
        part_ref[...] = jnp.broadcast_to(part, part_ref.shape).astype(jnp.float32)


# ----------------------------- per-level constants -----------------------------

def _prep_level(lv, w_dtype=jnp.bfloat16):
    """Pre-fused weights and codebook constants for one level (plain JAX)."""
    cb = lv['codebook'].astype(jnp.float32)                     # (m, k, d)
    m, k, d = cb.shape
    t = jnp.maximum(lv['temp'].astype(jnp.float32), EPS)[:, 0]  # LowerBound(Eps)
    ts = t / math.sqrt(k)                                       # temp / scale
    eye = jnp.eye(m, dtype=jnp.float32)

    # Encoder constants (scales folded in): logit = xq@bd_enc + x2g@expand + c2t
    cbs = cb * (2.0 * ts)[:, None, None]
    bd_enc = jnp.einsum('ij,jba->iajb', eye, cbs).reshape(m * d, m * k)
    gsum = jnp.repeat(eye, d, axis=0)                           # (C, m) group-sum
    expand = jnp.repeat(eye * (-ts)[None, :], k, axis=1)        # (m, m*k)
    c2t = (-(ts)[:, None] * jnp.sum(cb * cb, axis=-1)).reshape(1, m * k)
    bd_dec = jnp.einsum('ij,iba->ibja', eye, cb).reshape(m * k, m * d)

    # Fused Linear chains (biases folded through).
    w_lse, b_lse = lv['lse']
    w_qh, b_qh = lv['qh']
    prep = dict(
        wq=(w_lse @ w_qh).astype(w_dtype), bq=b_lse @ w_qh + b_qh,
        bd_enc=bd_enc.astype(w_dtype), gsum=gsum, expand=expand, c2t=c2t,
        bd_dec=bd_dec.astype(w_dtype),
    )
    if lv['lh'] is not None:
        w_lh, b_lh = lv['lh']
        prep['wlh'] = (w_lse @ w_lh).astype(w_dtype)
        prep['blh'] = b_lse @ w_lh + b_lh

    # Decoder: out = sample @ w_deq (+ former @ w_side) + bias
    w_dqh, b_dqh = lv['dqh']
    w_rh, b_rh = lv['rh']
    prep['w_deq'] = (bd_dec @ w_dqh @ w_rh).astype(w_dtype)
    bias = b_dqh @ w_rh + b_rh
    if lv['sh'] is not None:
        w_sh, b_sh = lv['sh']
        prep['w_side'] = (w_sh @ w_rh).astype(w_dtype)
        bias = bias + b_sh @ w_rh
    prep['bias'] = bias
    return prep


# ----------------------------- wrappers -----------------------------

def encoder_level(x, gumbel, prep, m, k, has_latent, tn):
    n_pad, c = x.shape
    mk = m * k
    grid = (n_pad // tn,)

    rowmap = lambda i: (i, 0)
    fixmap = lambda i: (0, 0)

    in_specs = [
        pl.BlockSpec((tn, c), rowmap),              # x (bf16)
        pl.BlockSpec((tn, mk), rowmap),             # gumbel noise (bf16)
        _const_spec((c, c), fixmap),                # fused W_lse@W_qh (bf16)
        _const_spec((1, c), fixmap),                # fused quant-head bias (f32)
        _const_spec((c, mk), fixmap),               # bd_enc, 2*t/s folded (bf16)
        _const_spec((c, m), fixmap),                # per-group sum ones (f32)
        _const_spec((m, mk), fixmap),               # per-group -t/s expand (f32)
        _const_spec((1, mk), fixmap),               # -t/s * |c|^2 row (f32)
    ]
    args = [x, gumbel, prep['wq'], prep['bq'], prep['bd_enc'], prep['gsum'],
            prep['expand'], prep['c2t']]
    out_shape = [jax.ShapeDtypeStruct((n_pad, mk), jnp.bfloat16),   # sample
                 jax.ShapeDtypeStruct((n_pad, mk), jnp.float32)]    # logit
    out_specs = [pl.BlockSpec((tn, mk), rowmap),
                 pl.BlockSpec((tn, mk), rowmap)]
    if has_latent:
        in_specs += [_const_spec((c, c), fixmap), _const_spec((1, c), fixmap),
                     _const_spec((mk, c), fixmap)]
        args += [prep['wlh'], prep['blh'], prep['bd_dec']]
        out_shape.append(jax.ShapeDtypeStruct((n_pad, c), jnp.bfloat16))  # residual
        out_specs.append(pl.BlockSpec((tn, c), rowmap))

    stream = (_nbytes((tn, c), jnp.bfloat16) + _nbytes((tn, mk), jnp.bfloat16)
              + _nbytes((tn, mk), jnp.bfloat16) + _nbytes((tn, mk), jnp.float32)
              + (_nbytes((tn, c), jnp.bfloat16) if has_latent else 0))
    const = (_nbytes((c, c), jnp.bfloat16) + _nbytes((1, c), jnp.float32)
             + _nbytes((c, mk), jnp.bfloat16) + _nbytes((c, m), jnp.float32)
             + _nbytes((m, mk), jnp.float32) + _nbytes((1, mk), jnp.float32))
    if has_latent:
        const += (_nbytes((c, c), jnp.bfloat16) + _nbytes((1, c), jnp.float32)
                  + _nbytes((mk, c), jnp.bfloat16))

    kern = functools.partial(_encoder_kernel, m=m, k=k, has_latent=has_latent)
    return pl.pallas_call(
        kern,
        out_shape=tuple(out_shape),
        grid=grid,
        in_specs=in_specs,
        out_specs=tuple(out_specs),
        compiler_params=pltpu.CompilerParams(
            dimension_semantics=("parallel",),
            vmem_limit_bytes=_vmem_limit(stream, const)),
    )(*args)


def decoder_level(sample, prep, former, x_gt, n_valid, tn, out_dtype):
    n_pad, mk = sample.shape
    c = prep['w_deq'].shape[1]
    grid_n = n_pad // tn
    has_side = former is not None
    has_loss = x_gt is not None

    rowmap = lambda i: (i, 0)
    fixmap = lambda i: (0, 0)

    in_specs = [pl.BlockSpec((tn, mk), rowmap),     # sample (bf16)
                _const_spec((mk, c), fixmap)]       # fused BD_dec@W_dqh@W_rh
    args = [sample, prep['w_deq']]
    if has_side:
        in_specs += [pl.BlockSpec((tn, c), rowmap), _const_spec((c, c), fixmap)]
        args += [former, prep['w_side']]
    in_specs.append(_const_spec((1, c), fixmap))    # fused bias (f32)
    args.append(prep['bias'])
    if has_loss:
        in_specs.append(pl.BlockSpec((tn, c), rowmap))
        args.append(x_gt)

    out_shape = [jax.ShapeDtypeStruct((n_pad, c), out_dtype)]
    out_specs = [pl.BlockSpec((tn, c), rowmap)]
    if has_loss:
        # One lane-dense (8, 128) partial tile per row block, reduced in JAX.
        out_shape.append(jax.ShapeDtypeStruct((grid_n * 8, 128), jnp.float32))
        out_specs.append(pl.BlockSpec((8, 128), lambda i: (i, 0)))

    stream = (_nbytes((tn, mk), jnp.bfloat16) + _nbytes((tn, c), out_dtype)
              + (_nbytes((tn, c), jnp.bfloat16) if has_side else 0)
              + (_nbytes((tn, c), jnp.float32) if has_loss else 0)
              + (_nbytes((8, 128), jnp.float32) if has_loss else 0))
    const = (_nbytes((mk, c), jnp.bfloat16) + _nbytes((1, c), jnp.float32)
             + (_nbytes((c, c), jnp.bfloat16) if has_side else 0))

    kern = functools.partial(
        _decoder_kernel, has_side=has_side, has_loss=has_loss,
        n_valid=n_valid, tile_rows=tn, inv_size=1.0 / float(n_valid * c))
    outs = pl.pallas_call(
        kern,
        out_shape=tuple(out_shape),
        grid=(grid_n,),
        in_specs=in_specs,
        out_specs=tuple(out_specs),
        compiler_params=pltpu.CompilerParams(
            dimension_semantics=("parallel",),
            vmem_limit_bytes=_vmem_limit(stream, const)),
    )(*args)
    return outs if has_loss else outs[0]


# ----------------------------- parameters -----------------------------

def _lin_init(key, c):
    kw, kb = jax.random.split(key)
    w = jax.random.normal(kw, (c, c), jnp.float32) * (1.0 / math.sqrt(c))
    b = jax.random.normal(kb, (1, c), jnp.float32) * 0.01
    return w, b


def init_params(key, channel, m, ks):
    c = channel
    d = c // m
    n_levels = len(ks)
    levels = []
    for i, ki in enumerate(ks):
        keys = jax.random.split(jax.random.fold_in(key, i), 7)
        lse = _lin_init(keys[0], c)
        qh = _lin_init(keys[1], c)
        lh = _lin_init(keys[2], c) if i < n_levels - 1 else None
        dqh = _lin_init(keys[3], c)
        sh = _lin_init(keys[4], c) if i < n_levels - 1 else None
        rh = _lin_init(keys[5], c)
        cb_std = math.sqrt(2.0 / (5.0 * c / m))
        codebook = jax.random.normal(keys[6], (m, ki, d), jnp.float32) * cb_std
        temp = jnp.ones((m, 1), jnp.float32)   # _temperature parameter, init ones
        levels.append(dict(lse=lse, qh=qh, lh=lh, dqh=dqh, sh=sh, rh=rh,
                           codebook=codebook, temp=temp))
    return levels


# ----------------------------- forward -----------------------------

def umgm_forward(x, levels, noise_key, row_tile=DEFAULT_ROW_TILE):
    """Mirrors UMGMQuantizer.forward: returns (formerLevel, codes, logits, code_loss)."""
    n, c = x.shape
    tn, n_pad = _choose_tile(n, row_tile)
    x_gt = x.astype(jnp.float32)
    if n_pad != n:
        x = jnp.pad(x, ((0, n_pad - n), (0, 0)))
        x_gt_pad = jnp.pad(x_gt, ((0, n_pad - n), (0, 0)))
    else:
        x_gt_pad = x_gt

    n_levels = len(levels)
    samples, logits, preps = [], [], []
    cur = x.astype(jnp.bfloat16)

    # Encoders: one fused pallas_call per level.
    for i, lv in enumerate(levels):
        m, ki, _ = lv['codebook'].shape
        prep = _prep_level(lv)
        preps.append(prep)
        has_latent = lv['lh'] is not None
        gumbel = jax.random.gumbel(jax.random.fold_in(noise_key, i),
                                   (n_pad, m * ki), jnp.bfloat16)
        outs = encoder_level(cur, gumbel, prep, m, ki, has_latent, tn)
        if has_latent:
            sample, logit, cur = outs
        else:
            sample, logit = outs
        samples.append(sample)
        logits.append(logit[:n].reshape(n, m, ki))   # metadata slice + reshape

    # codes = per-group argmax of the unperturbed logits, computed in JAX so
    # the kernels only do lane-dense stores (no narrow (tn, m) int32 stores).
    codes = [jnp.argmax(l, axis=-1).astype(jnp.int32) for l in logits]

    # Decoders: reverse order; the final (level-0) call also emits MSE partials.
    former, loss = None, None
    for i in reversed(range(n_levels)):
        has_loss = (i == 0)
        out_dtype = jnp.float32 if has_loss else jnp.bfloat16
        res = decoder_level(samples[i], preps[i], former,
                            x_gt_pad if has_loss else None, n, tn, out_dtype)
        if has_loss:
            former, partials = res
            # each block broadcasts its partial over an (8, 128) tile
            loss = jnp.sum(partials) * (1.0 / (8.0 * 128.0))
        else:
            former = res

    return former[:n], codes, logits, loss


# ----------------------------- main -----------------------------

if __name__ == "__main__":
    N, C, M = 120, 64, 4          # channel=64 (module default), m=4 -> d=16
    KS = [32, 32]                 # two quantization levels, m*k = 128 (lane-dense)
    ROW_TILE = 64                 # N=120 pads to 128 -> grid=(2,), exercises padding

    key = jax.random.PRNGKey(0)
    kx, kp, kn = jax.random.split(key, 3)
    x = jax.random.normal(kx, (N, C), jnp.float32)
    levels = init_params(kp, C, M, KS)

    former_level, codes, logits, code_loss = umgm_forward(
        x, levels, noise_key=kn, row_tile=ROW_TILE)
    jax.block_until_ready(former_level)
    jax.block_until_ready(code_loss)

    assert former_level.shape == (N, C)
    assert all(cd.shape == (N, M) for cd in codes)
    assert all(l.shape == (N, M, k) for l, k in zip(logits, KS))
    assert all(bool(jnp.all((cd >= 0) & (cd < k))) for cd, k in zip(codes, KS))
    assert code_loss.shape == ()
    assert bool(jnp.isfinite(code_loss))
    print("KERNEL_OK")
</pallas_src>

<mosaic_0001>
module attributes {stable_mosaic.version = 11 : i64} {
  func.func @_encoder_kernel(%arg0: i32, %arg1: memref<64x64xbf16, #tpu.memory_space<vmem>>, %arg2: memref<64x128xbf16, #tpu.memory_space<vmem>>, %arg3: memref<64x64xbf16, #tpu.memory_space<vmem>>, %arg4: memref<1x64xf32, #tpu.memory_space<vmem>>, %arg5: memref<64x128xbf16, #tpu.memory_space<vmem>>, %arg6: memref<64x4xf32, #tpu.memory_space<vmem>>, %arg7: memref<4x128xf32, #tpu.memory_space<vmem>>, %arg8: memref<1x128xf32, #tpu.memory_space<vmem>>, %arg9: memref<64x64xbf16, #tpu.memory_space<vmem>>, %arg10: memref<1x64xf32, #tpu.memory_space<vmem>>, %arg11: memref<128x64xbf16, #tpu.memory_space<vmem>>, %arg12: memref<64x128xbf16, #tpu.memory_space<vmem>>, %arg13: memref<64x128xf32, #tpu.memory_space<vmem>>, %arg14: memref<64x64xbf16, #tpu.memory_space<vmem>>) attributes {dimension_semantics = [#tpu.dimension_semantics<parallel>], iteration_bounds = array<i64: 2>, scalar_prefetch = 0 : i64, scratch_operands = 0 : i64, tpu.core_type = #tpu.core_type<tc>, window_params = [{transform_indices = @transform_0, window_bounds = array<i64: 64, 64>}, {transform_indices = @transform_1, window_bounds = array<i64: 64, 128>}, {pipeline_mode = #tpu.pipeline_mode<synchronous>, transform_indices = @transform_2, window_bounds = array<i64: 64, 64>}, {pipeline_mode = #tpu.pipeline_mode<synchronous>, transform_indices = @transform_3, window_bounds = array<i64: 1, 64>}, {pipeline_mode = #tpu.pipeline_mode<synchronous>, transform_indices = @transform_4, window_bounds = array<i64: 64, 128>}, {pipeline_mode = #tpu.pipeline_mode<synchronous>, transform_indices = @transform_5, window_bounds = array<i64: 64, 4>}, {pipeline_mode = #tpu.pipeline_mode<synchronous>, transform_indices = @transform_6, window_bounds = array<i64: 4, 128>}, {pipeline_mode = #tpu.pipeline_mode<synchronous>, transform_indices = @transform_7, window_bounds = array<i64: 1, 128>}, {pipeline_mode = #tpu.pipeline_mode<synchronous>, transform_indices = @transform_8, window_bounds = array<i64: 64, 64>}, {pipeline_mode = #tpu.pipeline_mode<synchronous>, transform_indices = @transform_9, window_bounds = array<i64: 1, 64>}, {pipeline_mode = #tpu.pipeline_mode<synchronous>, transform_indices = @transform_10, window_bounds = array<i64: 128, 64>}, {transform_indices = @transform_11, window_bounds = array<i64: 64, 128>}, {transform_indices = @transform_12, window_bounds = array<i64: 64, 128>}, {transform_indices = @transform_13, window_bounds = array<i64: 64, 64>}]} {
    %c0 = arith.constant 0 : index
    %c0_0 = arith.constant 0 : index
    %0 = vector.load %arg1[%c0, %c0_0] : memref<64x64xbf16, #tpu.memory_space<vmem>>, vector<64x64xbf16>
    %c0_1 = arith.constant 0 : index
    %c0_2 = arith.constant 0 : index
    %1 = vector.load %arg3[%c0_1, %c0_2] : memref<64x64xbf16, #tpu.memory_space<vmem>>, vector<64x64xbf16>
    %cst = arith.constant dense<0.000000e+00> : vector<64x64xf32>
    %2 = tpu.matmul %0, %1, %cst {dimension_numbers = #tpu.dot_dimension_numbers<[1], [0], [0], [1], [0, 0, 1, 1], [], []>} : vector<64x64xbf16>, vector<64x64xbf16>, vector<64x64xf32> -> vector<64x64xf32>
    %c0_3 = arith.constant 0 : index
    %c0_4 = arith.constant 0 : index
    %3 = vector.load %arg4[%c0_3, %c0_4] : memref<1x64xf32, #tpu.memory_space<vmem>>, vector<1x64xf32>
    %4 = vector.broadcast %3 : vector<1x64xf32> to vector<64x64xf32>
    %5 = arith.addf %2, %4 : vector<64x64xf32>
    %6 = arith.truncf %5 : vector<64x64xf32> to vector<64x64xbf16>
    %c0_5 = arith.constant 0 : index
    %c0_6 = arith.constant 0 : index
    %7 = vector.load %arg5[%c0_5, %c0_6] : memref<64x128xbf16, #tpu.memory_space<vmem>>, vector<64x128xbf16>
    %cst_7 = arith.constant dense<0.000000e+00> : vector<64x128xf32>
    %8 = tpu.matmul %6, %7, %cst_7 {dimension_numbers = #tpu.dot_dimension_numbers<[1], [0], [0], [1], [0, 0, 1, 1], [], []>} : vector<64x64xbf16>, vector<64x128xbf16>, vector<64x128xf32> -> vector<64x128xf32>
    %9 = arith.mulf %5, %5 : vector<64x64xf32>
    %c0_8 = arith.constant 0 : index
    %c0_9 = arith.constant 0 : index
    %10 = vector.load %arg6[%c0_8, %c0_9] : memref<64x4xf32, #tpu.memory_space<vmem>>, vector<64x4xf32>
    %cst_10 = arith.constant dense<0.000000e+00> : vector<64x4xf32>
    %11 = tpu.matmul %9, %10, %cst_10 {dimension_numbers = #tpu.dot_dimension_numbers<[1], [0], [0], [1], [0, 0, 1, 1], [], []>} : vector<64x64xf32>, vector<64x4xf32>, vector<64x4xf32> -> vector<64x4xf32>
    %c0_11 = arith.constant 0 : index
    %c0_12 = arith.constant 0 : index
    %12 = vector.load %arg7[%c0_11, %c0_12] : memref<4x128xf32, #tpu.memory_space<vmem>>, vector<4x128xf32>
    %cst_13 = arith.constant dense<0.000000e+00> : vector<64x128xf32>
    %13 = tpu.matmul %11, %12, %cst_13 {dimension_numbers = #tpu.dot_dimension_numbers<[1], [0], [0], [1], [0, 0, 1, 1], [], []>} : vector<64x4xf32>, vector<4x128xf32>, vector<64x128xf32> -> vector<64x128xf32>
    %14 = arith.addf %8, %13 : vector<64x128xf32>
    %c0_14 = arith.constant 0 : index
    %c0_15 = arith.constant 0 : index
    %15 = vector.load %arg8[%c0_14, %c0_15] : memref<1x128xf32, #tpu.memory_space<vmem>>, vector<1x128xf32>
    %16 = vector.broadcast %15 : vector<1x128xf32> to vector<64x128xf32>
    %17 = arith.addf %14, %16 : vector<64x128xf32>
    %c0_16 = arith.constant 0 : index
    %c0_17 = arith.constant 0 : index
    %18 = vector.load %arg13[%c0_16, %c0_17] : memref<64x128xf32, #tpu.memory_space<vmem>>, vector<64x128xf32>
    tpu.vector_store %arg13[%c0_16, %c0_17], %17 {strides = array<i32>} : memref<64x128xf32, #tpu.memory_space<vmem>>, vector<64x128xf32>,
    %c0_18 = arith.constant 0 : index
    %c0_19 = arith.constant 0 : index
    %19 = vector.load %arg2[%c0_18, %c0_19] : memref<64x128xbf16, #tpu.memory_space<vmem>>, vector<64x128xbf16>
    %20 = arith.extf %19 : vector<64x128xbf16> to vector<64x128xf32>
    %21 = arith.addf %17, %20 : vector<64x128xf32>
    %22 = tpu.iota {dimensions = array<i32: 1>} : vector<64x32xi32>
    %23 = vector.extract_strided_slice %21 {offsets = [0, 0], sizes = [64, 32], strides = [1, 1]} : vector<64x128xf32> to vector<64x32xf32>
    %cst_20 = arith.constant dense<0xFF800000> : vector<64xf32>
    %24 = vector.multi_reduction <maximumf>, %23, %cst_20 [1] : vector<64x32xf32> to vector<64xf32>
    %25 = vector.shape_cast %24 : vector<64xf32> to vector<64x1xf32>
    %26 = vector.broadcast %25 : vector<64x1xf32> to vector<64x32xf32>
    %27 = arith.cmpf oeq, %23, %26 : vector<64x32xf32>
    %c32_i32 = arith.constant 32 : i32
    %28 = vector.broadcast %c32_i32 : i32 to vector<64x32xi32>
    %29 = arith.select %27, %22, %28 : vector<64x32xi1>, vector<64x32xi32>
    %cst_21 = arith.constant dense<2147483647> : vector<64xi32>
    %30 = vector.multi_reduction <minsi>, %29, %cst_21 [1] : vector<64x32xi32> to vector<64xi32>
    %31 = vector.shape_cast %30 : vector<64xi32> to vector<64x1xi32>
    %32 = vector.broadcast %31 : vector<64x1xi32> to vector<64x32xi32>
    %33 = arith.cmpi eq, %22, %32 : vector<64x32xi32>
    %34 = arith.extui %33 : vector<64x32xi1> to vector<64x32xi32>
    %35 = arith.sitofp %34 : vector<64x32xi32> to vector<64x32xf32>
    %36 = arith.truncf %35 : vector<64x32xf32> to vector<64x32xbf16>
    %37 = vector.extract_strided_slice %21 {offsets = [0, 32], sizes = [64, 32], strides = [1, 1]} : vector<64x128xf32> to vector<64x32xf32>
    %cst_22 = arith.constant dense<0xFF800000> : vector<64xf32>
    %38 = vector.multi_reduction <maximumf>, %37, %cst_22 [1] : vector<64x32xf32> to vector<64xf32>
    %39 = vector.shape_cast %38 : vector<64xf32> to vector<64x1xf32>
    %40 = vector.broadcast %39 : vector<64x1xf32> to vector<64x32xf32>
    %41 = arith.cmpf oeq, %37, %40 : vector<64x32xf32>
    %c32_i32_23 = arith.constant 32 : i32
    %42 = vector.broadcast %c32_i32_23 : i32 to vector<64x32xi32>
    %43 = arith.select %41, %22, %42 : vector<64x32xi1>, vector<64x32xi32>
    %cst_24 = arith.constant dense<2147483647> : vector<64xi32>
    %44 = vector.multi_reduction <minsi>, %43, %cst_24 [1] : vector<64x32xi32> to vector<64xi32>
    %45 = vector.shape_cast %44 : vector<64xi32> to vector<64x1xi32>
    %46 = vector.broadcast %45 : vector<64x1xi32> to vector<64x32xi32>
    %47 = arith.cmpi eq, %22, %46 : vector<64x32xi32>
    %48 = arith.extui %47 : vector<64x32xi1> to vector<64x32xi32>
    %49 = arith.sitofp %48 : vector<64x32xi32> to vector<64x32xf32>
    %50 = arith.truncf %49 : vector<64x32xf32> to vector<64x32xbf16>
    %51 = vector.extract_strided_slice %21 {offsets = [0, 64], sizes = [64, 32], strides = [1, 1]} : vector<64x128xf32> to vector<64x32xf32>
    %cst_25 = arith.constant dense<0xFF800000> : vector<64xf32>
    %52 = vector.multi_reduction <maximumf>, %51, %cst_25 [1] : vector<64x32xf32> to vector<64xf32>
    %53 = vector.shape_cast %52 : vector<64xf32> to vector<64x1xf32>
    %54 = vector.broadcast %53 : vector<64x1xf32> to vector<64x32xf32>
    %55 = arith.cmpf oeq, %51, %54 : vector<64x32xf32>
    %c32_i32_26 = arith.constant 32 : i32
    %56 = vector.broadcast %c32_i32_26 : i32 to vector<64x32xi32>
    %57 = arith.select %55, %22, %56 : vector<64x32xi1>, vector<64x32xi32>
    %cst_27 = arith.constant dense<2147483647> : vector<64xi32>
    %58 = vector.multi_reduction <minsi>, %57, %cst_27 [1] : vector<64x32xi32> to vector<64xi32>
    %59 = vector.shape_cast %58 : vector<64xi32> to vector<64x1xi32>
    %60 = vector.broadcast %59 : vector<64x1xi32> to vector<64x32xi32>
    %61 = arith.cmpi eq, %22, %60 : vector<64x32xi32>
    %62 = arith.extui %61 : vector<64x32xi1> to vector<64x32xi32>
    %63 = arith.sitofp %62 : vector<64x32xi32> to vector<64x32xf32>
    %64 = arith.truncf %63 : vector<64x32xf32> to vector<64x32xbf16>
    %65 = vector.extract_strided_slice %21 {offsets = [0, 96], sizes = [64, 32], strides = [1, 1]} : vector<64x128xf32> to vector<64x32xf32>
    %cst_28 = arith.constant dense<0xFF800000> : vector<64xf32>
    %66 = vector.multi_reduction <maximumf>, %65, %cst_28 [1] : vector<64x32xf32> to vector<64xf32>
    %67 = vector.shape_cast %66 : vector<64xf32> to vector<64x1xf32>
    %68 = vector.broadcast %67 : vector<64x1xf32> to vector<64x32xf32>
    %69 = arith.cmpf oeq, %65, %68 : vector<64x32xf32>
    %c32_i32_29 = arith.constant 32 : i32
    %70 = vector.broadcast %c32_i32_29 : i32 to vector<64x32xi32>
    %71 = arith.select %69, %22, %70 : vector<64x32xi1>, vector<64x32xi32>
    %cst_30 = arith.constant dense<2147483647> : vector<64xi32>
    %72 = vector.multi_reduction <minsi>, %71, %cst_30 [1] : vector<64x32xi32> to vector<64xi32>
    %73 = vector.shape_cast %72 : vector<64xi32> to vector<64x1xi32>
    %74 = vector.broadcast %73 : vector<64x1xi32> to vector<64x32xi32>
    %75 = arith.cmpi eq, %22, %74 : vector<64x32xi32>
    %76 = arith.extui %75 : vector<64x32xi1> to vector<64x32xi32>
    %77 = arith.sitofp %76 : vector<64x32xi32> to vector<64x32xf32>
    %78 = arith.truncf %77 : vector<64x32xf32> to vector<64x32xbf16>
    %79 = tpu.concatenate %36, %50, %64, %78 in 1 : vector<64x32xbf16>, vector<64x32xbf16>, vector<64x32xbf16>, vector<64x32xbf16> -> vector<64x128xbf16>
    %c0_31 = arith.constant 0 : index
    %c0_32 = arith.constant 0 : index
    %80 = vector.load %arg12[%c0_31, %c0_32] : memref<64x128xbf16, #tpu.memory_space<vmem>>, vector<64x128xbf16>
    tpu.vector_store %arg12[%c0_31, %c0_32], %79 {strides = array<i32>} : memref<64x128xbf16, #tpu.memory_space<vmem>>, vector<64x128xbf16>,
    %c0_33 = arith.constant 0 : index
    %c0_34 = arith.constant 0 : index
    %81 = vector.load %arg9[%c0_33, %c0_34] : memref<64x64xbf16, #tpu.memory_space<vmem>>, vector<64x64xbf16>
    %cst_35 = arith.constant dense<0.000000e+00> : vector<64x64xf32>
    %82 = tpu.matmul %0, %81, %cst_35 {dimension_numbers = #tpu.dot_dimension_numbers<[1], [0], [0], [1], [0, 0, 1, 1], [], []>} : vector<64x64xbf16>, vector<64x64xbf16>, vector<64x64xf32> -> vector<64x64xf32>
    %c0_36 = arith.constant 0 : index
    %c0_37 = arith.constant 0 : index
    %83 = vector.load %arg10[%c0_36, %c0_37] : memref<1x64xf32, #tpu.memory_space<vmem>>, vector<1x64xf32>
    %84 = vector.broadcast %83 : vector<1x64xf32> to vector<64x64xf32>
    %85 = arith.addf %82, %84 : vector<64x64xf32>
    %c0_38 = arith.constant 0 : index
    %c0_39 = arith.constant 0 : index
    %86 = vector.load %arg11[%c0_38, %c0_39] : memref<128x64xbf16, #tpu.memory_space<vmem>>, vector<128x64xbf16>
    %cst_40 = arith.constant dense<0.000000e+00> : vector<64x64xf32>
    %87 = tpu.matmul %79, %86, %cst_40 {dimension_numbers = #tpu.dot_dimension_numbers<[1], [0], [0], [1], [0, 0, 1, 1], [], []>} : vector<64x128xbf16>, vector<128x64xbf16>, vector<64x64xf32> -> vector<64x64xf32>
    %88 = arith.subf %85, %87 : vector<64x64xf32>
    %89 = arith.truncf %88 : vector<64x64xf32> to vector<64x64xbf16>
    %c0_41 = arith.constant 0 : index
    %c0_42 = arith.constant 0 : index
    %90 = vector.load %arg14[%c0_41, %c0_42] : memref<64x64xbf16, #tpu.memory_space<vmem>>, vector<64x64xbf16>
    tpu.vector_store %arg14[%c0_41, %c0_42], %89 {strides = array<i32>} : memref<64x64xbf16, #tpu.memory_space<vmem>>, vector<64x64xbf16>,
    return
  }
  func.func @transform_0(%arg0: i32) -> (i32, i32) {
    %c0_i32 = arith.constant 0 : i32
    %c0_i32_0 = arith.constant 0 : i32
    return %arg0, %c0_i32 : i32, i32
  }
  func.func @transform_1(%arg0: i32) -> (i32, i32) {
    %c0_i32 = arith.constant 0 : i32
    %c0_i32_0 = arith.constant 0 : i32
    return %arg0, %c0_i32 : i32, i32
  }
  func.func @transform_2(%arg0: i32) -> (i32, i32) {
    %c0_i32 = arith.constant 0 : i32
    %c0_i32_0 = arith.constant 0 : i32
    %c0_i32_1 = arith.constant 0 : i32
    return %c0_i32, %c0_i32_0 : i32, i32
  }
  func.func @transform_3(%arg0: i32) -> (i32, i32) {
    %c0_i32 = arith.constant 0 : i32
    %c0_i32_0 = arith.constant 0 : i32
    %c0_i32_1 = arith.constant 0 : i32
    return %c0_i32, %c0_i32_0 : i32, i32
  }
  func.func @transform_4(%arg0: i32) -> (i32, i32) {
    %c0_i32 = arith.constant 0 : i32
    %c0_i32_0 = arith.constant 0 : i32
    %c0_i32_1 = arith.constant 0 : i32
    return %c0_i32, %c0_i32_0 : i32, i32
  }
  func.func @transform_5(%arg0: i32) -> (i32, i32) {
    %c0_i32 = arith.constant 0 : i32
    %c0_i32_0 = arith.constant 0 : i32
    %c0_i32_1 = arith.constant 0 : i32
    return %c0_i32, %c0_i32_0 : i32, i32
  }
  func.func @transform_6(%arg0: i32) -> (i32, i32) {
    %c0_i32 = arith.constant 0 : i32
    %c0_i32_0 = arith.constant 0 : i32
    %c0_i32_1 = arith.constant 0 : i32
    return %c0_i32, %c0_i32_0 : i32, i32
  }
  func.func @transform_7(%arg0: i32) -> (i32, i32) {
    %c0_i32 = arith.constant 0 : i32
    %c0_i32_0 = arith.constant 0 : i32
    %c0_i32_1 = arith.constant 0 : i32
    return %c0_i32, %c0_i32_0 : i32, i32
  }
  func.func @transform_8(%arg0: i32) -> (i32, i32) {
    %c0_i32 = arith.constant 0 : i32
    %c0_i32_0 = arith.constant 0 : i32
    %c0_i32_1 = arith.constant 0 : i32
    return %c0_i32, %c0_i32_0 : i32, i32
  }
  func.func @transform_9(%arg0: i32) -> (i32, i32) {
    %c0_i32 = arith.constant 0 : i32
    %c0_i32_0 = arith.constant 0 : i32
    %c0_i32_1 = arith.constant 0 : i32
    return %c0_i32, %c0_i32_0 : i32, i32
  }
  func.func @transform_10(%arg0: i32) -> (i32, i32) {
    %c0_i32 = arith.constant 0 : i32
    %c0_i32_0 = arith.constant 0 : i32
    %c0_i32_1 = arith.constant 0 : i32
    return %c0_i32, %c0_i32_0 : i32, i32
  }
  func.func @transform_11(%arg0: i32) -> (i32, i32) {
    %c0_i32 = arith.constant 0 : i32
    %c0_i32_0 = arith.constant 0 : i32
    return %arg0, %c0_i32 : i32, i32
  }
  func.func @transform_12(%arg0: i32) -> (i32, i32) {
    %c0_i32 = arith.constant 0 : i32
    %c0_i32_0 = arith.constant 0 : i32
    return %arg0, %c0_i32 : i32, i32
  }
  func.func @transform_13(%arg0: i32) -> (i32, i32) {
    %c0_i32 = arith.constant 0 : i32
    %c0_i32_0 = arith.constant 0 : i32
    return %arg0, %c0_i32 : i32, i32
  }
}

</mosaic_0001>

<bundles_post_ra>
// kernel: tpu_custom_call.1
= control target key start
LH: loop header
LB: loop body
LE: loop exit
PB: predicated region body
PF: predicated region fallthrough
CT: control target
= control target key end

     0   :  { %s4008_s0 = inlined_call_operand.vmem [shape: bf16[128,64], index: 0, kind: input, shape index: {}]   ;;  %s4009_s1 = inlined_call_operand.vmem [shape: bf16[128,128], index: 1, kind: input, shape index: {}]   ;;  %s4010_s2 = inlined_call_operand.vmem [shape: bf16[64,64], index: 2, kind: input, shape index: {}]   ;;  %s4011_s3 = inlined_call_operand.vmem [shape: f32[1,64], index: 3, kind: input, shape index: {}]   ;;  %s4012_s4 = inlined_call_operand.vmem [shape: bf16[64,128], index: 4, kind: input, shape index: {}]   ;;  %s4013_s5 = inlined_call_operand.vmem [shape: f32[64,4], index: 5, kind: input, shape index: {}]   ;;  %s4014_s6 = inlined_call_operand.vmem [shape: f32[4,128], index: 6, kind: input, shape index: {}]   ;;  %s4015_s7 = inlined_call_operand.vmem [shape: f32[1,128], index: 7, kind: input, shape index: {}]   ;;  %s4016_s8 = inlined_call_operand.vmem [shape: bf16[64,64], index: 8, kind: input, shape index: {}]   ;;  %s4017_s9 = inlined_call_operand.vmem [shape: f32[1,64], index: 9, kind: input, shape index: {}]   ;;  %s4018_s10 = inlined_call_operand.vmem [shape: bf16[128,64], index: 10, kind: input, shape index: {}]   ;;  %s4019_s11 = inlined_call_operand.hbm [shape: bf16[128,128], index: 11, kind: output, shape index: {0}]   ;;  %s4020_s12 = inlined_call_operand.hbm [shape: f32[128,128], index: 12, kind: output, shape index: {1}]   ;;  %s4021_s13 = inlined_call_operand.vmem [shape: bf16[128,64], index: 13, kind: output, shape index: {2}]  }
   0x1   :  { %4043 = sst [smem:[#allocation22_spill]] %s4008_s0 }
   0x2   :  { %4044 = sst [smem:[#allocation23_spill]] %s4009_s1 }
   0x3   :  { %4045 = sst [smem:[#allocation24_spill]] %s4010_s2 }
   0x4   :  { %4046 = sst [smem:[#allocation25_spill]] %s4011_s3 }
   0x5   :  { %4047 = sst [smem:[#allocation26_spill]] %s4012_s4 }
   0x6   :  { %19 = vsyncpa [#allocation3], 0 }
   0x7   :  { %21 = vsyncpa [#allocation3 + $0x1], 0 }
   0x8   :  { %22 = vsyncpa [#allocation5], 0 }
   0x9   :  { %24 = vsyncpa [#allocation5 + $0x1], 0  ;;  %s2978_s25 = smov 0   ;;  %s2980_s26 = smov 0  }
   0xa   :  { %s2982_s27 = smov 0   ;;  %s2984_s28 = smov 0  }
   0xb LB: > { %4048 = sst [smem:[#allocation8_spill]] %s2893_s27  ;;  %s2999_s29 = sadd.s32 4294967295, %s2897_s28   ;;  %s2897_s28 = sphi %s2984_s28, %s4085_s28   ;;  %s2893_s27 = sphi %s2982_s27, %s4087_s27   ;;  %s2889_s26 = sphi %s2980_s26, %s4089_s26   ;;  %s2885_s25 = sphi %s2978_s25, %s4088_s25  }
   0xc   : > { %s2401_s30 = sadd.s32 4294967294, %s2897_s28   ;;  %s3003_s14 = sadd.s32 1, %s2897_s28  }
   0xd   : > { %4049 = sst [smem:[#allocation9_spill]] %s3003_s14  ;;  %s278_s15 = sadd.s32 1, %s2893_s27 }
   0xe   : > { %s275_s16 = ssub.s32 %s2897_s28, %s3003_s14  ;;  %p288_p0 = scmp.ne.s32.totalorder %s2893_s27, %s2889_s26 }
   0xf   : > { %p276_p1 = scmp.eq.s32.totalorder %s275_s16, 0  ;;  %p289_p2 = scmp.eq.s32.totalorder %s2999_s29, 1 }
  0x10   : > { %p294_p3 = scmp.ne.s32.totalorder %s2889_s26, %s2885_s25  ;;  %p295_p4 = scmp.eq.s32.totalorder %s2401_s30, 1 }
  0x11   : > { %s3014_s17 = scalar_select %p276_p1, %s2893_s27, %s278_s15  }
  0x12   : > { %p3016_p5 = por %p289_p2, %p288_p0  ;;  %p3020_p6 = por %p295_p4, %p294_p3 }
  0x13   : > { %4050 = sst [smem:[#allocation10_spill]] %s3014_s17  ;;  %p2404_p7 = scmp.ge.s32.totalorder %s2897_s28, 1 }
  0x14   : > { %p410_p8 = scmp.lt.s32.totalorder %s2897_s28, 3 }
  0x16   : > { %p411_p9 = pnand %p2404_p7, %p410_p8 }
  0x18   : > { %414 = sbr.rel (%p411_p9) target bundleno = 1494 (0x5d6), region = 64 }
  0x1d   : > { %s4053_s2 = sld [smem:[#allocation24_spill]]  ;;  %s2407_s22 = sshll.u32 %s2999_s29, 3  ;;  %vm557_vm0 = vcmask 523264   ;;  %v662_v3 = vld [vmem:[%s4013_s5 + $0x38] sm:$0xff]  ;;  %v661_v4 = vld [vmem:[%s4013_s5 + $0x30] sm:$0xff]  ;;  %v660_v5 = vld [vmem:[%s4013_s5 + $0x28] sm:$0xff] }
  0x1e   : > { %p470_p10 = scmp.lt.s32.totalorder %s2407_s22, 15  ;;  %2631 = vmatprep.subr.mxu1 %v662_v3  ;;  %s4054_s0 = sld [smem:[#allocation22_spill]]  ;;  %v659_v11 = vld [vmem:[%s4013_s5 + $0x20] sm:$0xff]  ;;  %v658_v12 = vld [vmem:[%s4013_s5 + $0x18] sm:$0xff]  ;;  %v657_v13 = vld [vmem:[%s4013_s5 + $0x10] sm:$0xff]  ;;  %vm818_vm1 = vcmask 1043456  }
  0x1f   : > { %2632 = vmatpush3.msra.mxu1 %v662_v3  ;;  %v656_v14 = vld [vmem:[%s4013_s5 + $0x8] sm:$0xff]  ;;  %v655_v15 = vld [vmem:[%s4013_s5] sm:$0xff]  ;;  %s4055_s4 = sld [smem:[#allocation26_spill]]  ;;  %vm793_vm2 = vcmask 31744   ;;  %s3121_s17 = sand.u32 1, %s2889_s26   ;;  %vm1457_vm3 = vcmask 785920  }
  0x20   : > { %s4091_s22 = smov (!%p470_p10, %s2407_s22), 15  ;;  %2633 = vmatprep.subr.mxu1 %v661_v4  ;;  %v792_v17 = vld [vmem:[%s4014_s6] sm:$0xf]  ;;  %s4056_s3 = sld [smem:[#allocation25_spill]]  ;;  %vm1266_vm4 = vcmask 523520   ;;  %vm1648_vm5 = vcmask 1048320  }
  0x21   : > { %s3042_s23 = sshll.u32 %s4091_s22, 2  ;;  %2634 = vmatpush3.msra.mxu1 %v661_v4  ;;  %s4057_s1 = sld [smem:[#allocation23_spill]]  ;;  %vm1077_vm6 = vcmask 261120  }
  0x22   : > { %2635 = vmatprep.subr.mxu1 %v660_v5  ;;  %s2406_s22 = sshll.u32 %s3121_s17, 6  ;;  %s4039_s20 = smov 64  }
  0x23   : > { %v2780_v0 = vld [vmem:[%s4053_s2 + $0x18] sm:$0xff]   ;;  %v2781_v1 = vld [vmem:[%s4053_s2 + $0x10] sm:$0xff]   ;;  %v2782_v2 = vld [vmem:[%s4053_s2 + $0x8] sm:$0xff]   ;;  %2636 = vmatpush3.msra.mxu1 %v660_v5  ;;  %s3129_s16 = scalar_lea.vmem [#allocation4], %s2406_s22  ;;  %s4037_s21 = smov 96  }
  0x24   : > { %2615 = vmatprep.subr.bf16.mxu0 %v2780_v0  ;;  %s3051_s15 = scalar_lea.vmem %s4054_s0, %s3042_s23  ;;  %v2783_v7 = vld [vmem:[%s4053_s2] sm:$0xff]   ;;  %2637 = vmatprep.subr.mxu1 %v659_v11  ;;  %s4041_s24 = smov 32  }
  0x25   : > { %2616 = vmatpush3.bf16.msra.mxu0 %v2780_v0  ;;  %v3054_v6 = vld [vmem:[%s3051_s15] sm:$0xff]   ;;  %v2785_v8 = vld [vmem:[%s3051_s15 + $0x8] sm:$0xff]   ;;  %v2786_v9 = vld [vmem:[%s3051_s15 + $0x10] sm:$0xff]   ;;  %2638 = vmatpush3.msra.mxu1 %v659_v11  ;;  %s4080_s27 = smov 32   ;;  %s4081_s22 = smov 64  }
  0x26   : > { %2617 = vmatprep.subr.bf16.mxu0 %v2781_v1  ;;  %2623 = vmatprep.mubr.msk.bf16.mxu0 %vm557_vm0, %v3054_v6  ;;  %v2787_v10 = vld [vmem:[%s3051_s15 + $0x18] sm:$0xff]   ;;  %v2413_v19 = vld [vmem:[%s4056_s3] ss:$0 sm:$0xff]  ;;  %v2789_v30 = vld [vmem:[%s4055_s4 + $0x10] sm:$0xff]   ;;  %s4082_s0 = smov 96   ;;  %s2903_s2 = smov [#allocation2]  }
  0x27   : > { %2639 = vmatprep.subr.mxu1 %v658_v12  ;;  %v2788_v16 = vld [vmem:[%s4055_s4 + $0x18] sm:$0xff]   ;;  %v2790_v38 = vld [vmem:[%s4055_s4 + $0x8] sm:$0xff]   ;;  %v2791_v44 = vld [vmem:[%s4055_s4] sm:$0xff]   ;;  %s3118_s30 = scalar_lea.vmem %s4057_s1, %s3042_s23  ;;  %s2811_s3 = sshll.u32 %s2903_s2, 4  ;;  %s2812_s3 = int_to_ptr.vmem [resolvable:$false] %s2811_s3 }
  0x28   : > { %2640 = vmatpush3.msra.mxu1 %v658_v12  ;;  %v2536_v63 = vld [vmem:[%s3118_s30] sm:$0xff]   ;;  %v2551_v11 = vld [vmem:[%s3118_s30 + $0x8] sm:$0xff]  }
  0x29   : > { %2618 = vmatpush3.bf16.msra.mxu0 %v2781_v1  ;;  %2641 = vmatprep.subr.mxu1 %v657_v13  ;;  %v2538_v4 = vunpack.c.h.bf16 %v2536_v63 }
  0x2a   : > { %2619 = vmatprep.subr.bf16.mxu0 %v2782_v2  ;;  %2642 = vmatpush3.msra.mxu1 %v657_v13 }
  0x2b   : > { %2643 = vmatprep.subr.mxu1 %v656_v14 }
  0x2c   : > { %2644 = vmatpush3.msra.mxu1 %v656_v14 }
  0x2d   : > { %2620 = vmatpush3.bf16.msra.mxu0 %v2782_v2  ;;  %2645 = vmatprep.subr.mxu1 %v655_v15  ;;  %v2451_v2 = vld [vmem:[%s4015_s7] ss:$0 sm:$0xff] }
  0x2e   : > { %2621 = vmatprep.subr.bf16.mxu0 %v2783_v7  ;;  %2646 = vmatpush3.msra.mxu1 %v655_v15 }
  0x2f   : > { %2673 = vmatprep.subr.bf16.mxu1 %v2788_v16 }
  0x31   : > { %2622 = vmatpush3.bf16.msra.mxu0 %v2783_v7 }
  0x32   : > { %2659 = vmatprep.subr.msk.mxu0 %vm818_vm1, %v792_v17 }
  0x34   : > { %2624 = vmatmul.mubr.msk.bf16.vlgmr.msra.gmra.mxu0 %vm557_vm0, %v2785_v8 }
  0x35   : > { %2627 = vmatprep.mubr.msk.bf16.mxu0 %vm557_vm0, %v2786_v9  ;;  %2660 = vmatpush3.msk.msra.mxu0 %vm818_vm1, %v792_v17  ;;  %v2537_v9 = vunpack.c.l.bf16 %v2536_v63  ;;  %v2542_v17 = vunpack.c.h.bf16 %v2551_v11 }
  0x3c   : > { %2628 = vmatmul.mubr.msk.bf16.gmra.mxu0 %vm557_vm0, %v2787_v10 }
  0xf4   : > { %v2625_v18 = vpop.f32.mrf.mxu0 }
  0xf5   : > { %v613_v24 = vadd.f32 %v2625_v18, %v2413_v19 }
  0xf6   : > { %v604_v20 = vpop.f32.mrf.mxu0 }
  0xf7   : > { %v605_v21 = vadd.f32 %v2413_v19, %v604_v20  ;;  %v649_v31 = vmul.f32 %v613_v24, %v613_v24 }
  0xf8   : > { %v2626_v22 = vpop.f32.mrf.mxu0 }
  0xf9   : > { %v647_v23 = vmul.f32 %v605_v21, %v605_v21  ;;  %v616_v28 = vadd.f32 %v2626_v22, %v2413_v19 }
  0xfa   : > { %v607_v25 = vpop.f32.mrf.mxu0 }
  0xfb   : > { %v608_v26 = vadd.f32 %v2413_v19, %v607_v25  ;;  %2647 = vmatprep.mubr.msk.f32.mxu1 %vm557_vm0, %v647_v23  ;;  %v650_v36 = vmul.f32 %v616_v28, %v616_v28  ;;  %v636_v48 = vpack.c.bf16 %v616_v28, %v613_v24 }
  0xfc   : > { %v2629_v27 = vpop.f32.mrf.mxu0 }
  0xfd   : > { %v648_v29 = vmul.f32 %v608_v26, %v608_v26  ;;  %v629_v34 = vadd.f32 %v2629_v27, %v2413_v19  ;;  %v635_v46 = vpack.c.bf16 %v608_v26, %v605_v21 }
  0xfe   : > { %v620_v32 = vpop.f32.mrf.mxu0 }
  0xff   : > { %v621_v33 = vadd.f32 %v2413_v19, %v620_v32  ;;  %2648 = vmatmul.mubr.msk.f32.vlgmr.msra.gmra.mxu1 %vm557_vm0, %v648_v29  ;;  %v653_v42 = vmul.f32 %v629_v34, %v629_v34 }
 0x100   : > { %v2630_v35 = vpop.f32.mrf.mxu0  ;;  %2650 = vmatprep.mubr.msk.f32.mxu1 %vm557_vm0, %v649_v31  ;;  %2674 = vmatpush3.bf16.msra.mxu1 %v2788_v16 }
 0x101   : > { %v651_v37 = vmul.f32 %v621_v33, %v621_v33  ;;  %2675 = vmatprep.subr.bf16.mxu1 %v2789_v30  ;;  %v632_v40 = vadd.f32 %v2630_v35, %v2413_v19 }
 0x102   : > { %v623_v39 = vpop.f32.mrf.mxu0 }
 0x103   : > { %v624_v41 = vadd.f32 %v2413_v19, %v623_v39  ;;  %2651 = vmatmul.mubr.msk.f32.gmra.mxu1 %vm557_vm0, %v650_v36  ;;  %v654_v45 = vmul.f32 %v632_v40, %v632_v40  ;;  %v638_v49 = vpack.c.bf16 %v632_v40, %v629_v34  ;;  %v2541_v39 = vunpack.c.l.bf16 %v2551_v11 }
 0x104   : > { %2676 = vmatpush3.bf16.msra.mxu1 %v2789_v30  ;;  %2653 = vmatprep.mubr.msk.f32.mxu1 %vm557_vm0, %v651_v37 }
 0x105   : > { %v652_v43 = vmul.f32 %v624_v41, %v624_v41  ;;  %2677 = vmatprep.subr.bf16.mxu1 %v2790_v38  ;;  %v637_v47 = vpack.c.bf16 %v624_v41, %v621_v33 }
 0x107   : > { %2654 = vmatmul.mubr.msk.f32.gmra.mxu1 %vm557_vm0, %v652_v43 }
 0x108   : > { %2678 = vmatpush3.bf16.msra.mxu1 %v2790_v38  ;;  %2656 = vmatprep.mubr.msk.f32.mxu1 %vm557_vm0, %v653_v42 }
 0x109   : > { %2679 = vmatprep.subr.bf16.mxu1 %v2791_v44 }
 0x10b   : > { %2657 = vmatmul.mubr.msk.f32.gmra.mxu1 %vm557_vm0, %v654_v45 }
 0x10c   : > { %2680 = vmatpush3.bf16.msra.mxu1 %v2791_v44  ;;  %2681 = vmatprep.mubr.msk.bf16.mxu1 %vm557_vm0, %v635_v46  ;;  %v2552_v44 = vld [vmem:[%s3118_s30 + $0x10] sm:$0xff]  }
 0x10d   : > { %v2546_v46 = vunpack.c.h.bf16 %v2552_v44 }
 0x10f   : > { %2682 = vmatmul.mubr.msk.bf16.vlgmr.msra.gmra.mxu1 %vm557_vm0, %v636_v48  ;;  %v2545_v48 = vunpack.c.l.bf16 %v2552_v44 }
 0x110   : > { %2685 = vmatprep.mubr.msk.bf16.mxu1 %vm557_vm0, %v637_v47 }
 0x117   : > { %2686 = vmatmul.mubr.msk.bf16.gmra.mxu1 %vm557_vm0, %v638_v49 }
 0x1bf   : > { %v2649_v50 = vpop.f32.mrf.mxu1 }
 0x1c1   : > { %v753_v51 = vpop.f32.mrf.mxu1 }
 0x1c2   : > { %2661 = vmatprep.mubr.msk.f32.mxu0 %vm793_vm2, %v753_v51 }
 0x1c3   : > { %v2652_v52 = vpop.f32.mrf.mxu1  ;;  %2662 = vmatmul.mubr.msk.f32.vlgmr.msra.gmra.mxu0 %vm793_vm2, %v2649_v50 }
 0x1c5   : > { %v763_v53 = vpop.f32.mrf.mxu1 }
 0x1c6   : > { %2664 = vmatprep.mubr.msk.f32.mxu0 %vm793_vm2, %v763_v53 }
 0x1c7   : > { %v2655_v54 = vpop.f32.mrf.mxu1  ;;  %2665 = vmatmul.mubr.msk.f32.gmra.mxu0 %vm793_vm2, %v2652_v52 }
 0x1c9   : > { %v773_v55 = vpop.f32.mrf.mxu1 }
 0x1ca   : > { %2667 = vmatprep.mubr.msk.f32.mxu0 %vm793_vm2, %v773_v55  ;;  %v2553_v55 = vld [vmem:[%s3118_s30 + $0x18] sm:$0xff]  }
 0x1cb   : > { %v2658_v56 = vpop.f32.mrf.mxu1  ;;  %2668 = vmatmul.mubr.msk.f32.gmra.mxu0 %vm793_vm2, %v2655_v54 }
 0x1cd   : > { %v783_v57 = vpop.f32.mrf.mxu1 }
 0x1ce   : > { %2670 = vmatprep.mubr.msk.f32.mxu0 %vm793_vm2, %v783_v57  ;;  %v2550_v57 = vunpack.c.h.bf16 %v2553_v55 }
 0x1cf   : > { %2671 = vmatmul.mubr.msk.f32.gmra.mxu0 %vm793_vm2, %v2658_v56  ;;  %v2683_v58 = vpop.f32.mrf.mxu1 }
 0x1d0   : > { %2697 = vmatprep.mubr.msk.bf16.mxu0 %vm557_vm0, %v3054_v6 }
 0x1d1   : > { %v997_v59 = vpop.f32.mrf.mxu1 }
 0x1d3   : > { %v2684_v60 = vpop.f32.mrf.mxu1 }
 0x1d5   : > { %v1000_v61 = vpop.f32.mrf.mxu1 }
 0x1d7   : > { %v2687_v62 = vpop.f32.mrf.mxu1 }
 0x1d9   : > { %v1013_v0 = vpop.f32.mrf.mxu1 }
 0x1db   : > { %v2688_v8 = vpop.f32.mrf.mxu1 }
 0x1dd   : > { %v1016_v20 = vpop.f32.mrf.mxu1 }
 0x283   : > { %v2663_v1 = vpop.f32.mrf.mxu0 }
 0x284   : > { %v1001_v3 = vadd.f32 %v2663_v1, %v1000_v61 }
 0x285   : > { %v888_v5 = vpop.f32.mrf.mxu0 }
 0x286   : > { %v1036_v6 = vadd.f32 %v2451_v2, %v1001_v3  ;;  %v998_v7 = vadd.f32 %v997_v59, %v888_v5  ;;  %v2549_v59 = vunpack.c.l.bf16 %v2553_v55 }
 0x287   : > { %v2666_v10 = vpop.f32.mrf.mxu0 }
 0x288   : > { %1044 = vst [vmem:[%s3129_s16 + $0x8] sm:$0xff] %v1036_v6  ;;  %v3132_v12 = vadd.f32 %v2538_v4, %v1036_v6  ;;  %v1035_v13 = vadd.f32 %v2451_v2, %v998_v7  ;;  %v1009_v14 = vadd.f32 %v2684_v60, %v2666_v10  ;;  %v1075_v7 = vlaneseq }
 0x289   : > { %v898_v15 = vpop.f32.mrf.mxu0 }
 0x28a   : > { %1043 = vst [vmem:[%s3129_s16] sm:$0xff] %v1035_v13  ;;  %v1038_v16 = vadd.f32 %v2451_v2, %v1009_v14  ;;  %v1006_v18 = vadd.f32 %v2683_v58, %v898_v15  ;;  %v1461_v19 = vsel %vm1457_vm3, %v3132_v12, -inf  ;;  %v3137_v21 = vadd.f32 %v2537_v9, %v1035_v13 }
 0x28b   : > { %v2669_v22 = vpop.f32.mrf.mxu0  ;;  %1462 = vmax.xlane.f32.xlu1 %v1461_v19  ;;  %v1270_v23 = vsel %vm1266_vm4, %v3132_v12, -inf  ;;  %v1652_v30 = vsel %vm1648_vm5, %v3132_v12, -inf  ;;  %v1081_v9 = vsel %vm1077_vm6, %v3132_v12, -inf }
 0x28c   : > { %1046 = vst [vmem:[%s3129_s16 + $0x18] sm:$0xff] %v1038_v16  ;;  %v1037_v24 = vadd.f32 %v2451_v2, %v1006_v18  ;;  %v1017_v25 = vadd.f32 %v2669_v22, %v1016_v20  ;;  %1271 = vmax.xlane.f32.xlu0 %v1270_v23  ;;  %v3142_v27 = vadd.f32 %v2542_v17, %v1038_v16  ;;  %v1267_v32 = vsel %vm1266_vm4, %v3137_v21, -inf }
 0x28d   : > { %v908_v26 = vpop.f32.mrf.mxu0  ;;  %v1458_v40 = vsel %vm1457_vm3, %v3137_v21, -inf  ;;  %v1649_v45 = vsel %vm1648_vm5, %v3137_v21, -inf  ;;  %v1078_v10 = vsel %vm1077_vm6, %v3137_v21, -inf }
 0x28e   : > { %1045 = vst [vmem:[%s3129_s16 + $0x10] sm:$0xff] %v1037_v24  ;;  %v1040_v28 = vadd.f32 %v2451_v2, %v1017_v25  ;;  %v1014_v29 = vadd.f32 %v1013_v0, %v908_v26  ;;  %v1276_v38 = vsel %vm1266_vm4, %v3142_v27, -inf  ;;  %v1467_v42 = vsel %vm1457_vm3, %v3142_v27, -inf }
 0x28f   : > { %v2672_v31 = vpop.f32.mrf.mxu0  ;;  %1653 = vmax.xlane.f32.xlu1 %v1652_v30  ;;  %v3159_v43 = vadd.f32 %v2541_v39, %v1037_v24  ;;  %v1658_v47 = vsel %vm1648_vm5, %v3142_v27, -inf  ;;  %v1087_v14 = vsel %vm1077_vm6, %v3142_v27, -inf }
 0x290   : > { %1048 = vst [vmem:[%s3129_s16 + $0x28] sm:$0xff] %v1040_v28  ;;  %v1039_v33 = vadd.f32 %v2451_v2, %v1014_v29  ;;  %v1025_v34 = vadd.f32 %v2688_v8, %v2672_v31  ;;  %1268 = vmax.xlane.f32.xlu0 %v1267_v32  ;;  %v3168_v50 = vadd.f32 %v2546_v46, %v1040_v28  ;;  %v3205_v8 = vand.u32 127, %v1075_v7 }
 0x291   : > { %v918_v35 = vpop.f32.mrf.mxu0  ;;  %v1464_v49 = vsel %vm1457_vm3, %v3159_v43, -inf  ;;  %v1273_v51 = vsel %vm1266_vm4, %v3159_v43, -inf  ;;  %v1655_v53 = vsel %vm1648_vm5, %v3159_v43, -inf  ;;  %v1084_v11 = vsel %vm1077_vm6, %v3159_v43, -inf }
 0x292   : > { %1047 = vst [vmem:[%s3129_s16 + $0x20] sm:$0xff] %v1039_v33  ;;  %v1042_v36 = vadd.f32 %v2451_v2, %v1025_v34  ;;  %v1022_v37 = vadd.f32 %v2687_v62, %v918_v35  ;;  %v3172_v52 = vadd.f32 %v2545_v48, %v1039_v33  ;;  %v1282_v54 = vsel %vm1266_vm4, %v3168_v50, -inf  ;;  %4058 = vst [vmem:[#allocation11_spill] sm:$0xff] %v3205_v8 }
 0x293   : > { %1277 = vmax.xlane.f32.xlu1 %v1276_v38  ;;  %v1473_v58 = vsel %vm1457_vm3, %v3168_v50, -inf  ;;  %v1664_v62 = vsel %vm1648_vm5, %v3168_v50, -inf  ;;  %v1093_v16 = vsel %vm1077_vm6, %v3168_v50, -inf }
 0x294   : > { %1050 = vst [vmem:[%s3129_s16 + $0x38] sm:$0xff] %v1042_v36  ;;  %v1041_v41 = vadd.f32 %v2451_v2, %v1022_v37  ;;  %1459 = vmax.xlane.f32.xlu0 %v1458_v40  ;;  %v1279_v56 = vsel %vm1266_vm4, %v3172_v52, -inf  ;;  %v1470_v60 = vsel %vm1457_vm3, %v3172_v52, -inf  ;;  %v3185_v61 = vadd.f32 %v2550_v57, %v1042_v36 }
 0x295   : > { %v1661_v0 = vsel %vm1648_vm5, %v3172_v52, -inf  ;;  %v1090_v13 = vsel %vm1077_vm6, %v3172_v52, -inf }
 0x296   : > { %1049 = vst [vmem:[%s3129_s16 + $0x30] sm:$0xff] %v1041_v41  ;;  %v3189_v63 = vadd.f32 %v2549_v59, %v1041_v41  ;;  %v1288_v1 = vsel %vm1266_vm4, %v3185_v61, -inf  ;;  %v1479_v3 = vsel %vm1457_vm3, %v3185_v61, -inf  ;;  %v1670_v5 = vsel %vm1648_vm5, %v3185_v61, -inf }
 0x297   : > { %1468 = vmax.xlane.f32.xlu1 %v1467_v42  ;;  %v1099_v17 = vsel %vm1077_vm6, %v3185_v61, -inf }
 0x298   : > { %1650 = vmax.xlane.f32.xlu0 %v1649_v45  ;;  %v1285_v2 = vsel %vm1266_vm4, %v3189_v63, -inf  ;;  %v1476_v4 = vsel %vm1457_vm3, %v3189_v63, -inf  ;;  %v1667_v6 = vsel %vm1648_vm5, %v3189_v63, -inf  ;;  %v1096_v15 = vsel %vm1077_vm6, %v3189_v63, -inf }
 0x29b   : > { %1659 = vmax.xlane.f32.xlu1 %v1658_v47 }
 0x29c   : > { %1465 = vmax.xlane.f32.xlu0 %v1464_v49 }
 0x29f   : > { %1274 = vmax.xlane.f32.xlu1 %v1273_v51 }
 0x2a0   : > { %1656 = vmax.xlane.f32.xlu0 %v1655_v53 }
 0x2a3   : > { %1283 = vmax.xlane.f32.xlu1 %v1282_v54 }
 0x2a4   : > { %1280 = vmax.xlane.f32.xlu0 %v1279_v56 }
 0x2a7   : > { %1474 = vmax.xlane.f32.xlu1 %v1473_v58 }
 0x2a8   : > { %1471 = vmax.xlane.f32.xlu0 %v1470_v60 }
 0x2ab   : > { %1665 = vmax.xlane.f32.xlu1 %v1664_v62 }
 0x2ac   : > { %1662 = vmax.xlane.f32.xlu0 %v1661_v0 }
 0x2af   : > { %1289 = vmax.xlane.f32.xlu1 %v1288_v1 }
 0x2b0   : > { %1286 = vmax.xlane.f32.xlu0 %v1285_v2 }
 0x2b3   : > { %1480 = vmax.xlane.f32.xlu1 %v1479_v3 }
 0x2b4   : > { %1477 = vmax.xlane.f32.xlu0 %v1476_v4 }
 0x2b7   : > { %1671 = vmax.xlane.f32.xlu1 %v1670_v5 }
 0x2b8   : > { %1668 = vmax.xlane.f32.xlu0 %v1667_v6 }
 0x2c8   : > { %1490 = vrot.lane.b32.xlu1 %v3205_v8, %s4039_s20 }
 0x2cc   : > { %1681 = vrot.lane.b32.xlu1 %v3205_v8, %s4037_s21  ;;  %s2533_s21 = sshll.u32 %s2999_s29, 9 }
 0x2cd   : > { %s3903_s30 = scalar_lea.hbm %s4019_s11, %s2533_s21 }
 0x2ce   : > { %1299 = vrot.lane.b32.xlu0 %v3205_v8, %s4041_s24 }
 0x2ed   : > { %1082 = vmax.xlane.f32.xlu0 %v1081_v9 }
 0x2f0   : > { %1079 = vmax.xlane.f32.xlu1 %v1078_v10 }
 0x2f1   : > { %1085 = vmax.xlane.f32.xlu0 %v1084_v11 }
 0x2f4   : > { %1091 = vmax.xlane.f32.xlu1 %v1090_v13 }
 0x2f5   : > { %1088 = vmax.xlane.f32.xlu0 %v1087_v14 }
 0x2f8   : > { %1097 = vmax.xlane.f32.xlu1 %v1096_v15 }
 0x2f9   : > { %1094 = vmax.xlane.f32.xlu0 %v1093_v16 }
 0x2fd   : > { %1100 = vmax.xlane.f32.xlu0 %v1099_v17 }
 0x314   : > { %v1463_v18 = vpop.xlane.xlu1 %1462 }
 0x315   : > { %v1272_v19 = vpop.xlane.xlu0 %1271  ;;  %vm1483_vm7 = vcmp.eq.f32.partialorder %v3132_v12, %v1463_v18 }
 0x316   : > { %vm1292_vm9 = vcmp.eq.f32.partialorder %v3132_v12, %v1272_v19 }
 0x318   : > { %v1654_v20 = vpop.xlane.xlu1 %1653 }
 0x319   : > { %v1269_v22 = vpop.xlane.xlu0 %1268  ;;  %vm1674_vm11 = vcmp.eq.f32.partialorder %v3132_v12, %v1654_v20 }
 0x31a   : > { %vm1291_vm10 = vcmp.eq.f32.partialorder %v3137_v21, %v1269_v22 }
 0x31c   : > { %v1278_v23 = vpop.xlane.xlu1 %1277 }
 0x31d   : > { %v1460_v24 = vpop.xlane.xlu0 %1459  ;;  %vm1294_vm13 = vcmp.eq.f32.partialorder %v3142_v27, %v1278_v23 }
 0x31e   : > { %vm1482_vm8 = vcmp.eq.f32.partialorder %v3137_v21, %v1460_v24 }
 0x320   : > { %v1469_v25 = vpop.xlane.xlu1 %1468 }
 0x321   : > { %v1651_v26 = vpop.xlane.xlu0 %1650  ;;  %vm1485_vm15 = vcmp.eq.f32.partialorder %v3142_v27, %v1469_v25 }
 0x322   : > { %vm1673_vm12 = vcmp.eq.f32.partialorder %v3137_v21, %v1651_v26 }
 0x324   : > { %v3229_v28 = vpop.xlane.xlu1 %1659 }
 0x325   : > { %v1466_v29 = vpop.xlane.xlu0 %1465  ;;  %vm1676_vm2 = vcmp.eq.f32.partialorder %v3142_v27, %v3229_v28 }
 0x326   : > { %vm1484_vm1 = vcmp.eq.f32.partialorder %v3159_v43, %v1466_v29 }
 0x328   : > { %v1275_v30 = vpop.xlane.xlu1 %1274 }
 0x329   : > { %v3231_v31 = vpop.xlane.xlu0 %1656  ;;  %vm1293_vm14 = vcmp.eq.f32.partialorder %v3159_v43, %v1275_v30 }
 0x32c   : > { %v3233_v32 = vpop.xlane.xlu1 %1283 }
 0x32d   : > { %v3235_v33 = vpop.xlane.xlu0 %1280 }
 0x330   : > { %v3237_v34 = vpop.xlane.xlu1 %1474 }
 0x331   : > { %v3239_v35 = vpop.xlane.xlu0 %1471 }
 0x334   : > { %v3241_v36 = vpop.xlane.xlu1 %1665 }
 0x335   : > { %v3243_v37 = vpop.xlane.xlu0 %1662 }
 0x338   : > { %v3245_v38 = vpop.xlane.xlu1 %1289 }
 0x339   : > { %v3247_v39 = vpop.xlane.xlu0 %1286 }
 0x33c   : > { %v3249_v40 = vpop.xlane.xlu1 %1480 }
 0x33d   : > { %v3251_v41 = vpop.xlane.xlu0 %1477 }
 0x340   : > { %v3253_v42 = vpop.xlane.xlu1 %1671 }
 0x341   : > { %v3255_v44 = vpop.xlane.xlu0 %1668 }
 0x344   : > { %v3259_v45 = vpop.permute.xlu1 %1490 }
 0x345   : > { %v3263_v46 = vpop.permute.xlu0 %1299  ;;  %v1493_v47 = vsel %vm1483_vm7, %v3259_v45, 32  ;;  %v1492_v48 = vsel %vm1482_vm8, %v3259_v45, 32  ;;  %v1495_v16 = vsel %vm1485_vm15, %v3259_v45, 32  ;;  %v1494_v17 = vsel %vm1484_vm1, %v3259_v45, 32 }
 0x346   : > { %v1302_v49 = vsel %vm1292_vm9, %v3263_v46, 32  ;;  %v1301_v51 = vsel %vm1291_vm10, %v3263_v46, 32  ;;  %v3270_v53 = vsel %vm1457_vm3, %v1493_v47, 2147483647  ;;  %v3279_v56 = vsel %vm1457_vm3, %v1492_v48, 2147483647 }
 0x347   : > { %v3273_v54 = vsel %vm1266_vm4, %v1302_v49, 2147483647  ;;  %v3276_v55 = vsel %vm1266_vm4, %v1301_v51, 2147483647  ;;  %v1517_v2 = vshra.s32 %v3270_v53, 16  ;;  %v1502_v3 = vshra.s32 %v3279_v56, 16 }
 0x348   : > { %v3283_v57 = vpop.permute.xlu1 %1681  ;;  %v1326_v58 = vshra.s32 %v3273_v54, 16  ;;  %v1311_v59 = vshra.s32 %v3276_v55, 16  ;;  %v1304_v6 = vsel %vm1294_vm13, %v3263_v46, 32  ;;  %v1303_v7 = vsel %vm1293_vm14, %v3263_v46, 32 }
 0x349   : > { %v1684_v60 = vsel %vm1674_vm11, %v3283_v57, 32  ;;  %v1683_v62 = vsel %vm1673_vm12, %v3283_v57, 32  ;;  %v3307_v9 = vcvt.s32.f32 %v1517_v2  ;;  %v3309_v10 = vcvt.s32.f32 %v1502_v3 }
 0x34a   : > { %v3289_v0 = vcvt.s32.f32 %v1326_v58  ;;  %v3291_v1 = vcvt.s32.f32 %v1311_v59  ;;  %v3298_v4 = vsel %vm1648_vm5, %v1684_v60, 2147483647  ;;  %v3301_v5 = vsel %vm1648_vm5, %v1683_v62, 2147483647 }
 0x34b   : > { %v1708_v11 = vshra.s32 %v3298_v4, 16  ;;  %v1693_v13 = vshra.s32 %v3301_v5, 16  ;;  %v3316_v14 = vsel %vm1266_vm4, %v1304_v6, 2147483647  ;;  %v3319_v15 = vsel %vm1266_vm4, %v1303_v7, 2147483647 }
 0x34c   : > { %1329 = vmin.xlane.f32.xlu0 %v3289_v0  ;;  %1314 = vmin.xlane.f32.xlu1 %v3291_v1  ;;  %v1356_v20 = vshra.s32 %v3316_v14, 16  ;;  %v1341_v22 = vshra.s32 %v3319_v15, 16  ;;  %vm1675_vm7 = vcmp.eq.f32.partialorder %v3159_v43, %v3231_v31  ;;  %v3336_v23 = vsel %vm1457_vm3, %v1495_v16, 2147483647 }
 0x34d   : > { %v3325_v18 = vcvt.s32.f32 %v1708_v11  ;;  %v3327_v19 = vcvt.s32.f32 %v1693_v13  ;;  %v3339_v24 = vsel %vm1457_vm3, %v1494_v17, 2147483647  ;;  %v1686_v25 = vsel %vm1676_vm2, %v3283_v57, 32 }
 0x34e   : > { %v1685_v26 = vsel %vm1675_vm7, %v3283_v57, 32  ;;  %v3345_v29 = vcvt.s32.f32 %v1356_v20  ;;  %v3347_v28 = vcvt.s32.f32 %v1341_v22  ;;  %v1547_v30 = vshra.s32 %v3336_v23, 16 }
 0x34f   : > { %v1532_v31 = vshra.s32 %v3339_v24, 16  ;;  %vm1296_vm8 = vcmp.eq.f32.partialorder %v3168_v50, %v3233_v32  ;;  %vm1295_vm9 = vcmp.eq.f32.partialorder %v3172_v52, %v3235_v33  ;;  %v3356_v47 = vsel %vm1648_vm5, %v1686_v25, 2147483647 }
 0x350   : > { %1520 = vmin.xlane.f32.xlu0 %v3307_v9  ;;  %1505 = vmin.xlane.f32.xlu1 %v3309_v10  ;;  %v3359_v48 = vsel %vm1648_vm5, %v1685_v26, 2147483647  ;;  %v1306_v49 = vsel %vm1296_vm8, %v3263_v46, 32  ;;  %v1305_v51 = vsel %vm1295_vm9, %v3263_v46, 32  ;;  %v3365_v58 = vcvt.s32.f32 %v1547_v30 }
 0x351   : > { %v3367_v32 = vcvt.s32.f32 %v1532_v31  ;;  %v1738_v33 = vshra.s32 %v3356_v47, 16  ;;  %v1723_v59 = vshra.s32 %v3359_v48, 16  ;;  %vm1487_vm10 = vcmp.eq.f32.partialorder %v3168_v50, %v3237_v34 }
 0x352   : > { %vm1486_vm11 = vcmp.eq.f32.partialorder %v3172_v52, %v3239_v35  ;;  %v3376_v60 = vsel %vm1266_vm4, %v1306_v49, 2147483647  ;;  %v3379_v62 = vsel %vm1266_vm4, %v1305_v51, 2147483647  ;;  %v1497_v2 = vsel %vm1487_vm10, %v3259_v45, 32 }
 0x353   : > { %v1496_v3 = vsel %vm1486_vm11, %v3259_v45, 32  ;;  %v3385_v6 = vcvt.s32.f32 %v1738_v33  ;;  %v3387_v34 = vcvt.s32.f32 %v1723_v59  ;;  %v1386_v35 = vshra.s32 %v3376_v60, 16 }
 0x354   : > { %1711 = vmin.xlane.f32.xlu0 %v3325_v18  ;;  %1696 = vmin.xlane.f32.xlu1 %v3327_v19  ;;  %v1371_v7 = vshra.s32 %v3379_v62, 16  ;;  %vm1678_vm12 = vcmp.eq.f32.partialorder %v3168_v50, %v3241_v36  ;;  %vm1677_vm13 = vcmp.eq.f32.partialorder %v3172_v52, %v3243_v37  ;;  %v3396_v11 = vsel %vm1457_vm3, %v1497_v2, 2147483647 }
 0x355   : > { %v3399_v13 = vsel %vm1457_vm3, %v1496_v3, 2147483647  ;;  %v1688_v16 = vsel %vm1678_vm12, %v3283_v57, 32  ;;  %v1687_v17 = vsel %vm1677_vm13, %v3283_v57, 32  ;;  %v3405_v20 = vcvt.s32.f32 %v1386_v35 }
 0x356   : > { %v3407_v36 = vcvt.s32.f32 %v1371_v7  ;;  %v1577_v37 = vshra.s32 %v3396_v11, 16  ;;  %v1562_v22 = vshra.s32 %v3399_v13, 16  ;;  %vm1298_vm14 = vcmp.eq.f32.partialorder %v3185_v61, %v3245_v38 }
 0x357   : > { %vm1297_vm15 = vcmp.eq.f32.partialorder %v3189_v63, %v3247_v39  ;;  %v3416_v25 = vsel %vm1648_vm5, %v1688_v16, 2147483647  ;;  %v3419_v26 = vsel %vm1648_vm5, %v1687_v17, 2147483647  ;;  %v1308_v30 = vsel %vm1298_vm14, %v3263_v46, 32 }
 0x358   : > { %1359 = vmin.xlane.f32.xlu0 %v3345_v29  ;;  %1344 = vmin.xlane.f32.xlu1 %v3347_v28  ;;  %v1307_v31 = vsel %vm1297_vm15, %v3263_v46, 32  ;;  %v3425_v49 = vcvt.s32.f32 %v1577_v37  ;;  %v3427_v38 = vcvt.s32.f32 %v1562_v22  ;;  %v1768_v39 = vshra.s32 %v3416_v25, 16 }
 0x359   : > { %v1753_v51 = vshra.s32 %v3419_v26, 16  ;;  %vm1489_vm1 = vcmp.eq.f32.partialorder %v3185_v61, %v3249_v40  ;;  %vm1488_vm2 = vcmp.eq.f32.partialorder %v3189_v63, %v3251_v41  ;;  %v3436_v33 = vsel %vm1266_vm4, %v1308_v30, 2147483647 }
 0x35a   : > { %v3439_v59 = vsel %vm1266_vm4, %v1307_v31, 2147483647  ;;  %v1499_v46 = vsel %vm1489_vm1, %v3259_v45, 32  ;;  %v1498_v2 = vsel %vm1488_vm2, %v3259_v45, 32  ;;  %v3445_v3 = vcvt.s32.f32 %v1768_v39 }
 0x35b   : > { %v3447_v40 = vcvt.s32.f32 %v1753_v51  ;;  %v1416_v41 = vshra.s32 %v3436_v33, 16  ;;  %v1401_v35 = vshra.s32 %v3439_v59, 16  ;;  %vm1680_vm4 = vcmp.eq.f32.partialorder %v3185_v61, %v3253_v42 }
 0x35c   : > { %1550 = vmin.xlane.f32.xlu0 %v3365_v58  ;;  %1535 = vmin.xlane.f32.xlu1 %v3367_v32  ;;  %vm1679_vm7 = vcmp.eq.f32.partialorder %v3189_v63, %v3255_v44  ;;  %v3456_v7 = vsel %vm1457_vm3, %v1499_v46, 2147483647  ;;  %v3459_v16 = vsel %vm1457_vm3, %v1498_v2, 2147483647  ;;  %v1690_v45 = vsel %vm1680_vm4, %v3283_v57, 32 }
 0x35d   : > { %v1689_v17 = vsel %vm1679_vm7, %v3283_v57, 32  ;;  %v3465_v37 = vcvt.s32.f32 %v1416_v41  ;;  %v3467_v42 = vcvt.s32.f32 %v1401_v35  ;;  %v1607_v44 = vshra.s32 %v3456_v7, 16 }
 0x35e   : > { %v1592_v22 = vshra.s32 %v3459_v16, 16  ;;  %v3472_v30 = vsel %vm1648_vm5, %v1690_v45, 2147483647  ;;  %v3475_v31 = vsel %vm1648_vm5, %v1689_v17, 2147483647 }
 0x35f   : > { %v3479_v39 = vcvt.s32.f32 %v1607_v44  ;;  %v1798_v51 = vshra.s32 %v3472_v30, 16  ;;  %v1783_v46 = vshra.s32 %v3475_v31, 16 }
 0x360   : > { %1741 = vmin.xlane.f32.xlu0 %v3385_v6  ;;  %1726 = vmin.xlane.f32.xlu1 %v3387_v34  ;;  %v3481_v57 = vcvt.s32.f32 %v1592_v22 }
 0x361   : > { %v3487_v41 = vcvt.s32.f32 %v1798_v51  ;;  %v3489_v35 = vcvt.s32.f32 %v1783_v46 }
 0x362   : > { %4059 = vst [vmem:[#allocation12_spill] sm:$0xff] %v3481_v57 }
 0x363   : > { %4060 = vst [vmem:[#allocation13_spill] sm:$0xff] %v3487_v41  ;;  %4061 = vst [vmem:[#allocation14_spill] sm:$0xff] %v3489_v35 }
 0x364   : > { %1389 = vmin.xlane.f32.xlu0 %v3405_v20  ;;  %1374 = vmin.xlane.f32.xlu1 %v3407_v36 }
 0x368   : > { %1580 = vmin.xlane.f32.xlu0 %v3425_v49  ;;  %1565 = vmin.xlane.f32.xlu1 %v3427_v38 }
 0x36c   : > { %1771 = vmin.xlane.f32.xlu0 %v3445_v3  ;;  %1756 = vmin.xlane.f32.xlu1 %v3447_v40 }
 0x370   : > { %1419 = vmin.xlane.f32.xlu0 %v3465_v37  ;;  %1404 = vmin.xlane.f32.xlu1 %v3467_v42 }
 0x374   : > { %1610 = vmin.xlane.f32.xlu0 %v3479_v39  ;;  %1595 = vmin.xlane.f32.xlu1 %v3481_v57 }
 0x376   : > { %v1083_v2 = vpop.xlane.xlu0 %1082 }
 0x377   : > { %vm1103_vm3 = vcmp.eq.f32.partialorder %v3132_v12, %v1083_v2 }
 0x378   : > { %v1111_v45 = vsel %vm1103_vm3, %v3205_v8, 32  ;;  %1801 = vmin.xlane.f32.xlu0 %v3487_v41  ;;  %1786 = vmin.xlane.f32.xlu1 %v3489_v35 }
 0x379   : > { %v3496_v17 = vsel %vm1077_vm6, %v1111_v45, 2147483647  ;;  %v1080_v44 = vpop.xlane.xlu1 %1079 }
 0x37a   : > { %v1086_v22 = vpop.xlane.xlu0 %1085  ;;  %vm1102_vm5 = vcmp.eq.f32.partialorder %v3137_v21, %v1080_v44  ;;  %v1135_v51 = vshra.s32 %v3496_v17, 16 }
 0x37b   : > { %vm1104_vm8 = vcmp.eq.f32.partialorder %v3159_v43, %v1086_v22  ;;  %v1110_v46 = vsel %vm1102_vm5, %v3205_v8, 32 }
 0x37c   : > { %v1112_v12 = vsel %vm1104_vm8, %v3205_v8, 32  ;;  %v3504_v2 = vsel %vm1077_vm6, %v1110_v46, 2147483647  ;;  %v3506_v41 = vcvt.s32.f32 %v1135_v51 }
 0x37d   : > { %v3509_v45 = vsel %vm1077_vm6, %v1112_v12, 2147483647  ;;  %v1092_v35 = vpop.xlane.xlu1 %1091  ;;  %v1120_v57 = vshra.s32 %v3504_v2, 16 }
 0x37e   : > { %4062 = vst [vmem:[#allocation15_spill] sm:$0xff] %v3506_v41  ;;  %4063 = vst [vmem:[#allocation16_spill] sm:$0xff] %v3509_v45  ;;  %1138 = vmin.xlane.f32.xlu0 %v3506_v41  ;;  %v1089_v21 = vpop.xlane.xlu0 %1088  ;;  %vm1106_vm9 = vcmp.eq.f32.partialorder %v3172_v52, %v1092_v35  ;;  %v1150_v22 = vshra.s32 %v3509_v45, 16 }
 0x37f   : > { %vm1105_vm10 = vcmp.eq.f32.partialorder %v3142_v27, %v1089_v21  ;;  %v1114_v43 = vsel %vm1106_vm9, %v3205_v8, 32  ;;  %v3516_v44 = vcvt.s32.f32 %v1120_v57 }
 0x380   : > { %v1113_v51 = vsel %vm1105_vm10, %v3205_v8, 32  ;;  %v3521_v46 = vsel %vm1077_vm6, %v1114_v43, 2147483647  ;;  %v3531_v35 = vcvt.s32.f32 %v1150_v22 }
 0x381   : > { %4064 = vst [vmem:[#allocation17_spill] sm:$0xff] %v3516_v44  ;;  %v3524_v12 = vsel %vm1077_vm6, %v1113_v51, 2147483647  ;;  %1123 = vmin.xlane.f32.xlu1 %v3516_v44  ;;  %v1098_v41 = vpop.xlane.xlu1 %1097  ;;  %v1180_v21 = vshra.s32 %v3521_v46, 16 }
 0x382   : > { %v1095_v52 = vpop.xlane.xlu0 %1094  ;;  %vm1108_vm11 = vcmp.eq.f32.partialorder %v3189_v63, %v1098_v41  ;;  %v1165_v27 = vshra.s32 %v3524_v12, 16 }
 0x383   : > { %vm1107_vm12 = vcmp.eq.f32.partialorder %v3168_v50, %v1095_v52  ;;  %v1116_v57 = vsel %vm1108_vm11, %v3205_v8, 32  ;;  %v3547_v41 = vcvt.s32.f32 %v1180_v21  ;;  %v1325_v21 = vand.u32 65535, %v3273_v54 }
 0x384   : > { %v1115_v43 = vsel %vm1107_vm12, %v3205_v8, 32  ;;  %v3536_v51 = vsel %vm1077_vm6, %v1116_v57, 2147483647  ;;  %v3538_v44 = vcvt.s32.f32 %v1165_v27 }
 0x385   : > { %v3541_v45 = vsel %vm1077_vm6, %v1115_v43, 2147483647  ;;  %1153 = vmin.xlane.f32.xlu1 %v3531_v35  ;;  %4066 = vst [vmem:[#allocation19_spill] sm:$0xff] %v3547_v41  ;;  %v1210_v22 = vshra.s32 %v3536_v51, 16 }
 0x386   : > { %4065 = vst [vmem:[#allocation18_spill] sm:$0xff] %v3538_v44  ;;  %1168 = vmin.xlane.f32.xlu0 %v3538_v44  ;;  %v1101_v50 = vpop.xlane.xlu0 %1100  ;;  %v1195_v63 = vshra.s32 %v3541_v45, 16 }
 0x387   : > { %vm1109_vm13 = vcmp.eq.f32.partialorder %v3185_v61, %v1101_v50  ;;  %v3559_v44 = vcvt.s32.f32 %v1210_v22  ;;  %v1310_v50 = vand.u32 65535, %v3276_v55  ;;  %v1501_v22 = vand.u32 65535, %v3279_v56 }
 0x388   : > { %v1117_v52 = vsel %vm1109_vm13, %v3205_v8, 32  ;;  %v3551_v27 = vcvt.s32.f32 %v1195_v63  ;;  %v1327_v8 = vcvt.s32.f32 %v1325_v21  ;;  %v1692_v56 = vand.u32 65535, %v3301_v5 }
 0x389   : > { %v3554_v57 = vsel %vm1077_vm6, %v1117_v52, 2147483647  ;;  %1183 = vmin.xlane.f32.xlu1 %v3547_v41  ;;  %v1516_v41 = vand.u32 65535, %v3270_v53  ;;  %v1707_v53 = vand.u32 65535, %v3298_v4  ;;  %v1355_v4 = vand.u32 65535, %v3316_v14 }
 0x38a   : > { %4067 = vst [vmem:[#allocation20_spill] sm:$0xff] %v3551_v27  ;;  %1198 = vmin.xlane.f32.xlu0 %v3551_v27  ;;  %v1225_v43 = vshra.s32 %v3554_v57, 16  ;;  %v1312_v27 = vcvt.s32.f32 %v1310_v50  ;;  %v1503_v50 = vcvt.s32.f32 %v1501_v22  ;;  %v1694_v22 = vcvt.s32.f32 %v1692_v56 }
 0x38b   : > { %v1518_v21 = vcvt.s32.f32 %v1516_v41  ;;  %v1709_v41 = vcvt.s32.f32 %v1707_v53  ;;  %v1340_v5 = vand.u32 65535, %v3319_v15  ;;  %v1546_v14 = vand.u32 65535, %v3336_v23 }
 0x38c   : > { %v3561_v61 = vcvt.s32.f32 %v1225_v43  ;;  %v1531_v15 = vand.u32 65535, %v3339_v24  ;;  %v1737_v23 = vand.u32 65535, %v3356_v47  ;;  %v1722_v24 = vand.u32 65535, %v3359_v48 }
 0x38d   : > { %1213 = vmin.xlane.f32.xlu1 %v3559_v44  ;;  %v1385_v47 = vand.u32 65535, %v3376_v60  ;;  %v1370_v48 = vand.u32 65535, %v3379_v62  ;;  %v1576_v60 = vand.u32 65535, %v3396_v11  ;;  %v1561_v62 = vand.u32 65535, %v3399_v13 }
 0x38e   : > { %4068 = vst [vmem:[#allocation21_spill] sm:$0xff] %v3561_v61  ;;  %1228 = vmin.xlane.f32.xlu0 %v3561_v61  ;;  %v1767_v11 = vand.u32 65535, %v3416_v25  ;;  %v1752_v13 = vand.u32 65535, %v3419_v26  ;;  %v1415_v25 = vand.u32 65535, %v3436_v33  ;;  %v1400_v26 = vand.u32 65535, %v3439_v59 }
 0x38f   : > { %v1606_v33 = vand.u32 65535, %v3456_v7  ;;  %v1591_v59 = vand.u32 65535, %v3459_v16  ;;  %v1797_v7 = vand.u32 65535, %v3472_v30  ;;  %v1782_v16 = vand.u32 65535, %v3475_v31  ;;  %v4070_v30 = vld [vmem:[#allocation13_spill] sm:$0xff]  ;;  %v4071_v31 = vld [vmem:[#allocation14_spill] sm:$0xff] }
 0x3d5   : > { %v3567_v63 = vpop.xlane.xlu0 %1329  ;;  %v3569_v52 = vpop.xlane.xlu1 %1314 }
 0x3d6   : > { %vm1331_vm14 = vcmp.eq.f32.partialorder %v3289_v0, %v3567_v63  ;;  %vm1316_vm15 = vcmp.eq.f32.partialorder %v3291_v1, %v3569_v52 }
 0x3d7   : > { %v1332_v43 = vsel %vm1331_vm14, %v1327_v8, inf  ;;  %v1317_v54 = vsel %vm1316_vm15, %v1312_v27, inf }
 0x3d8   : > { %1333 = vmin.xlane.f32.xlu0 %v1332_v43  ;;  %1318 = vmin.xlane.f32.xlu1 %v1317_v54 }
 0x3d9   : > { %v3577_v55 = vpop.xlane.xlu0 %1520  ;;  %v3579_v61 = vpop.xlane.xlu1 %1505 }
 0x3da   : > { %vm1522_vm1 = vcmp.eq.f32.partialorder %v3307_v9, %v3577_v55  ;;  %vm1507_vm2 = vcmp.eq.f32.partialorder %v3309_v10, %v3579_v61 }
 0x3db   : > { %v1523_v8 = vsel %vm1522_vm1, %v1518_v21, inf  ;;  %v1508_v0 = vsel %vm1507_vm2, %v1503_v50, inf  ;;  %v1357_v21 = vcvt.s32.f32 %v1355_v4  ;;  %v1342_v50 = vcvt.s32.f32 %v1340_v5 }
 0x3dc   : > { %1524 = vmin.xlane.f32.xlu0 %v1523_v8  ;;  %1509 = vmin.xlane.f32.xlu1 %v1508_v0  ;;  %v1548_v8 = vcvt.s32.f32 %v1546_v14  ;;  %v1533_v0 = vcvt.s32.f32 %v1531_v15  ;;  %v1739_v4 = vcvt.s32.f32 %v1737_v23  ;;  %v1724_v5 = vcvt.s32.f32 %v1722_v24 }
 0x3dd   : > { %v3587_v1 = vpop.xlane.xlu0 %1711  ;;  %v3589_v27 = vpop.xlane.xlu1 %1696  ;;  %v1769_v23 = vcvt.s32.f32 %v1767_v11  ;;  %v1754_v24 = vcvt.s32.f32 %v1752_v13 }
 0x3de   : > { %vm1713_vm4 = vcmp.eq.f32.partialorder %v3325_v18, %v3587_v1  ;;  %vm1698_vm7 = vcmp.eq.f32.partialorder %v3327_v19, %v3589_v27 }
 0x3df   : > { %v1714_v9 = vsel %vm1713_vm4, %v1709_v41, inf  ;;  %v1699_v10 = vsel %vm1698_vm7, %v1694_v22, inf }
 0x3e0   : > { %1715 = vmin.xlane.f32.xlu0 %v1714_v9  ;;  %1700 = vmin.xlane.f32.xlu1 %v1699_v10 }
 0x3e1   : > { %v3597_v43 = vpop.xlane.xlu0 %1359  ;;  %v3599_v54 = vpop.xlane.xlu1 %1344 }
 0x3e2   : > { %vm1361_vm3 = vcmp.eq.f32.partialorder %v3345_v29, %v3597_v43  ;;  %vm1346_vm5 = vcmp.eq.f32.partialorder %v3347_v28, %v3599_v54 }
 0x3e3   : > { %v1362_v18 = vsel %vm1361_vm3, %v1357_v21, inf  ;;  %v1347_v19 = vsel %vm1346_vm5, %v1342_v50, inf  ;;  %v1387_v21 = vcvt.s32.f32 %v1385_v47  ;;  %v1372_v50 = vcvt.s32.f32 %v1370_v48 }
 0x3e4   : > { %1363 = vmin.xlane.f32.xlu0 %v1362_v18  ;;  %1348 = vmin.xlane.f32.xlu1 %v1347_v19  ;;  %v1578_v18 = vcvt.s32.f32 %v1576_v60  ;;  %v1563_v19 = vcvt.s32.f32 %v1561_v62  ;;  %v1799_v62 = vcvt.s32.f32 %v1797_v7 }
 0x3e5   : > { %v3607_v53 = vpop.xlane.xlu0 %1550  ;;  %v3609_v56 = vpop.xlane.xlu1 %1535 }
 0x3e6   : > { %vm1552_vm8 = vcmp.eq.f32.partialorder %v3365_v58, %v3607_v53  ;;  %vm1537_vm9 = vcmp.eq.f32.partialorder %v3367_v32, %v3609_v56 }
 0x3e7   : > { %v1553_v29 = vsel %vm1552_vm8, %v1548_v8, inf  ;;  %v1538_v28 = vsel %vm1537_vm9, %v1533_v0, inf }
 0x3e8   : > { %1554 = vmin.xlane.f32.xlu0 %v1553_v29  ;;  %1539 = vmin.xlane.f32.xlu1 %v1538_v28 }
 0x3e9   : > { %v3617_v41 = vpop.xlane.xlu0 %1741  ;;  %v3619_v22 = vpop.xlane.xlu1 %1726 }
 0x3ea   : > { %vm1743_vm10 = vcmp.eq.f32.partialorder %v3385_v6, %v3617_v41  ;;  %vm1728_vm11 = vcmp.eq.f32.partialorder %v3387_v34, %v3619_v22 }
 0x3eb   : > { %v1744_v58 = vsel %vm1743_vm10, %v1739_v4, inf  ;;  %v1729_v32 = vsel %vm1728_vm11, %v1724_v5, inf  ;;  %v1417_v4 = vcvt.s32.f32 %v1415_v25  ;;  %v1402_v5 = vcvt.s32.f32 %v1400_v26  ;;  %v4073_v25 = vld [vmem:[#allocation16_spill] sm:$0xff] }
 0x3ec   : > { %1745 = vmin.xlane.f32.xlu0 %v1744_v58  ;;  %1730 = vmin.xlane.f32.xlu1 %v1729_v32  ;;  %v1608_v58 = vcvt.s32.f32 %v1606_v33  ;;  %v1593_v32 = vcvt.s32.f32 %v1591_v59  ;;  %v1149_v26 = vand.u32 65535, %v4073_v25  ;;  %v1527_v25 = vcvt.f32.s32 %v3577_v55 }
 0x3ed   : > { %v3627_v9 = vpop.xlane.xlu0 %1389  ;;  %v3629_v10 = vpop.xlane.xlu1 %1374 }
 0x3ee   : > { %vm1391_vm12 = vcmp.eq.f32.partialorder %v3405_v20, %v3627_v9  ;;  %vm1376_vm13 = vcmp.eq.f32.partialorder %v3407_v36, %v3629_v10 }
 0x3ef   : > { %v1392_v6 = vsel %vm1391_vm12, %v1387_v21, inf  ;;  %v1377_v34 = vsel %vm1376_vm13, %v1372_v50, inf }
 0x3f0   : > { %1393 = vmin.xlane.f32.xlu0 %v1392_v6  ;;  %1378 = vmin.xlane.f32.xlu1 %v1377_v34  ;;  %v1784_v6 = vcvt.s32.f32 %v1782_v16  ;;  %v1224_v16 = vand.u32 65535, %v3554_v57  ;;  %v4078_v57 = vld [vmem:[#allocation21_spill] sm:$0xff] }
 0x3f1   : > { %v3637_v14 = vpop.xlane.xlu0 %1580  ;;  %v3639_v15 = vpop.xlane.xlu1 %1565 }
 0x3f2   : > { %vm1582_vm14 = vcmp.eq.f32.partialorder %v3425_v49, %v3637_v14  ;;  %vm1567_vm15 = vcmp.eq.f32.partialorder %v3427_v38, %v3639_v15 }
 0x3f3   : > { %v1583_v20 = vsel %vm1582_vm14, %v1578_v18, inf  ;;  %v1568_v36 = vsel %vm1567_vm15, %v1563_v19, inf  ;;  %v1134_v18 = vand.u32 65535, %v3496_v17  ;;  %v1119_v19 = vand.u32 65535, %v3504_v2 }
 0x3f4   : > { %1584 = vmin.xlane.f32.xlu0 %v1583_v20  ;;  %1569 = vmin.xlane.f32.xlu1 %v1568_v36  ;;  %v4072_v20 = vld [vmem:[#allocation15_spill] sm:$0xff]  ;;  %v1164_v17 = vand.u32 65535, %v3524_v12 }
 0x3f5   : > { %v3647_v8 = vpop.xlane.xlu0 %1771  ;;  %v3649_v0 = vpop.xlane.xlu1 %1756  ;;  %v1136_v13 = vcvt.s32.f32 %v1134_v18  ;;  %v2792_v18 = vld [vmem:[%s4018_s10 + $0x38] sm:$0xff]  }
 0x3f6   : > { %vm1773_vm1 = vcmp.eq.f32.partialorder %v3445_v3, %v3647_v8  ;;  %vm1758_vm2 = vcmp.eq.f32.partialorder %v3447_v40, %v3649_v0  ;;  %v1166_v59 = vcvt.s32.f32 %v1164_v17  ;;  %2705 = vmatprep.subr.bf16.mxu1 %v2792_v18 }
 0x3f7   : > { %v1774_v49 = vsel %vm1773_vm1, %v1769_v23, inf  ;;  %v1759_v38 = vsel %vm1758_vm2, %v1754_v24, inf  ;;  %v1121_v24 = vcvt.s32.f32 %v1119_v19  ;;  %v2793_v19 = vld [vmem:[%s4018_s10 + $0x30] sm:$0xff]   ;;  %2706 = vmatpush3.bf16.msra.mxu1 %v2792_v18  ;;  %v1366_v18 = vcvt.f32.s32 %v3597_v43 }
 0x3f8   : > { %1775 = vmin.xlane.f32.xlu0 %v1774_v49  ;;  %1760 = vmin.xlane.f32.xlu1 %v1759_v38  ;;  %v4074_v49 = vld [vmem:[#allocation17_spill] sm:$0xff] }
 0x3f9   : > { %v3657_v29 = vpop.xlane.xlu0 %1419  ;;  %v3659_v28 = vpop.xlane.xlu1 %1404  ;;  %2707 = vmatprep.subr.bf16.mxu1 %v2793_v19 }
 0x3fa   : > { %vm1421_vm4 = vcmp.eq.f32.partialorder %v3465_v37, %v3657_v29  ;;  %vm1406_vm7 = vcmp.eq.f32.partialorder %v3467_v42, %v3659_v28  ;;  %v4069_v37 = vld [vmem:[#allocation12_spill] sm:$0xff] }
 0x3fb   : > { %v1422_v3 = vsel %vm1421_vm4, %v1417_v4, inf  ;;  %v1407_v40 = vsel %vm1406_vm7, %v1402_v5, inf  ;;  %v1151_v4 = vcvt.s32.f32 %v1149_v26  ;;  %v1179_v5 = vand.u32 65535, %v3521_v46  ;;  %2708 = vmatpush3.bf16.msra.mxu1 %v2793_v19 }
 0x3fc   : > { %1423 = vmin.xlane.f32.xlu0 %v1422_v3  ;;  %1408 = vmin.xlane.f32.xlu1 %v1407_v40  ;;  %v1194_v3 = vand.u32 65535, %v3541_v45  ;;  %v4075_v40 = vld [vmem:[#allocation18_spill] sm:$0xff]  ;;  %v1209_v46 = vand.u32 65535, %v3536_v51  ;;  %v4077_v45 = vld [vmem:[#allocation20_spill] sm:$0xff]  ;;  %v1226_v51 = vcvt.s32.f32 %v1224_v16  ;;  %v1512_v26 = vcvt.f32.s32 %v3579_v61  ;;  %v2799_v61 = vld [vmem:[%s4018_s10 + $0x10] sm:$0xff]  }
 0x3fd   : > { %v3667_v47 = vpop.xlane.xlu0 %1610  ;;  %v3669_v48 = vpop.xlane.xlu1 %1595  ;;  %v1181_v7 = vcvt.s32.f32 %v1179_v5  ;;  %v1351_v19 = vcvt.f32.s32 %v3599_v54 }
 0x3fe   : > { %vm1612_vm3 = vcmp.eq.f32.partialorder %v3479_v39, %v3667_v47  ;;  %vm1597_vm5 = vcmp.eq.f32.partialorder %v4069_v37, %v3669_v48 }
 0x3ff   : > { %v1613_v42 = vsel %vm1612_vm3, %v1608_v58, inf  ;;  %v1598_v21 = vsel %vm1597_vm5, %v1593_v32, inf }
 0x400   : > { %1614 = vmin.xlane.f32.xlu0 %v1613_v42  ;;  %1599 = vmin.xlane.f32.xlu1 %v1598_v21  ;;  %v1196_v42 = vcvt.s32.f32 %v1194_v3 }
 0x401   : > { %v3677_v50 = vpop.xlane.xlu0 %1801  ;;  %v3679_v60 = vpop.xlane.xlu1 %1786 }
 0x402   : > { %vm1803_vm8 = vcmp.eq.f32.partialorder %v4070_v30, %v3677_v50  ;;  %vm1788_vm9 = vcmp.eq.f32.partialorder %v4071_v31, %v3679_v60  ;;  %v1211_v30 = vcvt.s32.f32 %v1209_v46 }
 0x403   : > { %v1804_v39 = vsel %vm1803_vm8, %v1799_v62, inf  ;;  %v1789_v34 = vsel %vm1788_vm9, %v1784_v6, inf }
 0x404   : > { %1805 = vmin.xlane.f32.xlu0 %v1804_v39  ;;  %1790 = vmin.xlane.f32.xlu1 %v1789_v34 }
 0x407   : > { %v3687_v11 = vpop.xlane.xlu0 %1138 }
 0x408   : > { %vm1140_vm10 = vcmp.eq.f32.partialorder %v4072_v20, %v3687_v11  ;;  %v2796_v20 = vld [vmem:[%s4016_s8 + $0x18] sm:$0xff]  }
 0x409   : > { %v1141_v36 = vsel %vm1140_vm10, %v1136_v13, inf  ;;  %v2795_v13 = vld [vmem:[%s4018_s10 + $0x20] sm:$0xff]   ;;  %2689 = vmatprep.subr.bf16.mxu0 %v2796_v20 }
 0x40a   : > { %1142 = vmin.xlane.f32.xlu0 %v1141_v36  ;;  %v3691_v23 = vpop.xlane.xlu1 %1123  ;;  %v1336_v36 = vcvt.f32.s32 %v3567_v63  ;;  %2690 = vmatpush3.bf16.msra.mxu0 %v2796_v20  ;;  %v2798_v63 = vld [vmem:[%s4016_s8 + $0x10] sm:$0xff]   ;;  %v2801_v20 = vld [vmem:[%s4018_s10 + $0x8] sm:$0xff]  }
 0x40b   : > { %vm1125_vm11 = vcmp.eq.f32.partialorder %v4074_v49, %v3691_v23  ;;  %2691 = vmatprep.subr.bf16.mxu0 %v2798_v63 }
 0x40c   : > { %v1126_v38 = vsel %vm1125_vm11, %v1121_v24, inf  ;;  %v1321_v24 = vcvt.f32.s32 %v3569_v52 }
 0x40d   : > { %1127 = vmin.xlane.f32.xlu1 %v1126_v38  ;;  %v2797_v38 = vld [vmem:[%s4018_s10 + $0x18] sm:$0xff]  }
 0x40e   : > { %v3697_v2 = vpop.xlane.xlu1 %1153  ;;  %v1322_v52 = vshll.u32 %v1321_v24, 16  ;;  %2692 = vmatpush3.bf16.msra.mxu0 %v2798_v63  ;;  %v1352_v63 = vshll.u32 %v1351_v19, 16 }
 0x40f   : > { %v3700_v33 = vpop.xlane.xlu0 %1168  ;;  %vm1155_vm12 = vcmp.eq.f32.partialorder %v3531_v35, %v3697_v2  ;;  %v4076_v35 = vld [vmem:[#allocation19_spill] sm:$0xff] }
 0x410   : > { %vm1170_vm13 = vcmp.eq.f32.partialorder %v4075_v40, %v3700_v33  ;;  %v1156_v58 = vsel %vm1155_vm12, %v1151_v4, inf  ;;  %v1337_v4 = vshll.u32 %v1336_v36, 16  ;;  %v1528_v40 = vshll.u32 %v1527_v25, 16  ;;  %v2802_v36 = vld [vmem:[%s4016_s8] sm:$0xff]  }
 0x411   : > { %v1171_v12 = vsel %vm1170_vm13, %v1166_v59, inf  ;;  %1157 = vmin.xlane.f32.xlu1 %v1156_v58  ;;  %v1513_v58 = vshll.u32 %v1512_v26, 16 }
 0x412   : > { %1172 = vmin.xlane.f32.xlu0 %v1171_v12  ;;  %v3707_v32 = vpop.xlane.xlu1 %1183  ;;  %v1718_v12 = vcvt.f32.s32 %v3587_v1  ;;  %v2800_v1 = vld [vmem:[%s4016_s8 + $0x8] sm:$0xff]  }
 0x413   : > { %v3711_v37 = vpop.xlane.xlu0 %1198  ;;  %vm1185_vm14 = vcmp.eq.f32.partialorder %v4076_v35, %v3707_v32  ;;  %2693 = vmatprep.subr.bf16.mxu0 %v2800_v1 }
 0x414   : > { %vm1200_vm15 = vcmp.eq.f32.partialorder %v4077_v45, %v3711_v37  ;;  %v1186_v21 = vsel %vm1185_vm14, %v1181_v7, inf  ;;  %v1703_v7 = vcvt.f32.s32 %v3589_v27  ;;  %v1719_v27 = vshll.u32 %v1718_v12, 16  ;;  %2694 = vmatpush3.bf16.msra.mxu0 %v2800_v1 }
 0x415   : > { %v1201_v62 = vsel %vm1200_vm15, %v1196_v42, inf  ;;  %1187 = vmin.xlane.f32.xlu1 %v1186_v21  ;;  %v4079_v42 = vld [vmem:[#allocation11_spill] sm:$0xff]  ;;  %v2902_v21 = vmov 0.0   ;;  %2695 = vmatprep.subr.bf16.mxu0 %v2802_v36 }
 0x416   : > { %1202 = vmin.xlane.f32.xlu0 %v1201_v62  ;;  %v3717_v6 = vpop.xlane.xlu1 %1213 }
 0x417   : > { %v3719_v31 = vpop.xlane.xlu0 %1228  ;;  %vm1215_vm1 = vcmp.eq.f32.partialorder %v3559_v44, %v3717_v6  ;;  %v2794_v44 = vld [vmem:[%s4018_s10 + $0x28] sm:$0xff]  }
 0x418   : > { %vm1230_vm2 = vcmp.eq.f32.partialorder %v4078_v57, %v3719_v31  ;;  %v1216_v39 = vsel %vm1215_vm1, %v1211_v30, inf  ;;  %2709 = vmatprep.subr.bf16.mxu1 %v2794_v44  ;;  %2696 = vmatpush3.bf16.msra.mxu0 %v2802_v36 }
 0x419   : > { %v1231_v34 = vsel %vm1230_vm2, %v1226_v51, inf  ;;  %1217 = vmin.xlane.f32.xlu1 %v1216_v39  ;;  %2710 = vmatpush3.bf16.msra.mxu1 %v2794_v44 }
 0x41a   : > { %1232 = vmin.xlane.f32.xlu0 %v1231_v34  ;;  %2711 = vmatprep.subr.bf16.mxu1 %v2795_v13  ;;  %v1704_v34 = vshll.u32 %v1703_v7, 16 }
 0x41d   : > { %2712 = vmatpush3.bf16.msra.mxu1 %v2795_v13 }
 0x41e   : > { %2713 = vmatprep.subr.bf16.mxu1 %v2797_v38 }
 0x421   : > { %2714 = vmatpush3.bf16.msra.mxu1 %v2797_v38  ;;  %v1367_v38 = vshll.u32 %v1366_v18, 16 }
 0x422   : > { %2715 = vmatprep.subr.bf16.mxu1 %v2799_v61 }
 0x425   : > { %2716 = vmatpush3.bf16.msra.mxu1 %v2799_v61 }
 0x426   : > { %2717 = vmatprep.subr.bf16.mxu1 %v2801_v20 }
 0x429   : > { %2718 = vmatpush3.bf16.msra.mxu1 %v2801_v20 }
 0x461   : > { %v1334_v49 = vpop.xlane.xlu0 %1333  ;;  %v1319_v17 = vpop.xlane.xlu1 %1318 }
 0x462   : > { %v1335_v5 = vcvt.f32.s32 %v1334_v49  ;;  %v1320_v59 = vcvt.f32.s32 %v1319_v17 }
 0x464   : > { %v1338_v3 = vadd.s32 %v1337_v4, %v1335_v5  ;;  %v1323_v55 = vadd.s32 %v1322_v52, %v1320_v59  ;;  %v1557_v4 = vcvt.f32.s32 %v3607_v53  ;;  %v1542_v52 = vcvt.f32.s32 %v3609_v56 }
 0x465   : > { %v1525_v46 = vpop.xlane.xlu0 %1524  ;;  %v1510_v16 = vpop.xlane.xlu1 %1509 }
 0x466   : > { %vm1430_vm4 = vcmp.eq.s32.totalorder %v4079_v42, %v1338_v3  ;;  %vm1429_vm7 = vcmp.eq.s32.totalorder %v4079_v42, %v1323_v55  ;;  %v1526_v35 = vcvt.f32.s32 %v1525_v46  ;;  %v1511_v45 = vcvt.f32.s32 %v1510_v16  ;;  %v2803_v3 = vld [vmem:[%s4018_s10] sm:$0xff]  }
 0x467   : > { %v2461_v62 = vsel %vm1430_vm4, 1.0, %v2902_v21  ;;  %v2460_v30 = vsel %vm1429_vm7, 1.0, %v2902_v21  ;;  %2719 = vmatprep.subr.bf16.mxu1 %v2803_v3  ;;  %v1558_v7 = vshll.u32 %v1557_v4, 16  ;;  %v1543_v46 = vshll.u32 %v1542_v52, 16 }
 0x468   : > { %v1453_v51 = vpack.c.bf16 %v2461_v62, %v2460_v30  ;;  %v1529_v57 = vadd.s32 %v1528_v40, %v1526_v35  ;;  %v1514_v39 = vadd.s32 %v1513_v58, %v1511_v45  ;;  %2720 = vmatpush3.bf16.msra.mxu1 %v2803_v3  ;;  %v1748_v16 = vcvt.f32.s32 %v3617_v41  ;;  %v2805_v41 = vld [vmem:[%s3051_s15 + $0x10] sm:$0xff]   ;;  %v2806_v3 = vld [vmem:[%s3051_s15 + $0x18] sm:$0xff]  }
 0x469   : > { %v1716_v44 = vpop.xlane.xlu0 %1715  ;;  %v1701_v13 = vpop.xlane.xlu1 %1700  ;;  %v1733_v35 = vcvt.f32.s32 %v3619_v22 }
 0x46a   : > { %vm1621_vm3 = vcmp.eq.s32.totalorder %v4079_v42, %v1529_v57  ;;  %vm1620_vm5 = vcmp.eq.s32.totalorder %v4079_v42, %v1514_v39  ;;  %v1717_v24 = vcvt.f32.s32 %v1716_v44  ;;  %v1702_v25 = vcvt.f32.s32 %v1701_v13  ;;  %1843 = vrot.lane.b32.xlu1 %v1453_v51, %s4080_s27  ;;  %v2804_v57 = vld [vmem:[%s3051_s15 + $0x8] sm:$0xff]   ;;  %s2405_s15 = sshll.u32 %s3121_s17, 5 }
 0x46b   : > { %v2469_v43 = vsel %vm1621_vm3, 1.0, %v2902_v21  ;;  %v2468_v54 = vsel %vm1620_vm5, 1.0, %v2902_v21  ;;  %2698 = vmatmul.mubr.msk.bf16.vlgmr.msra.gmra.mxu0 %vm557_vm0, %v2804_v57  ;;  %v1749_v18 = vshll.u32 %v1748_v16, 16  ;;  %v1734_v19 = vshll.u32 %v1733_v35, 16  ;;  %s3873_s20 = scalar_lea.vmem [#allocation2], %s2405_s15 }
 0x46c   : > { %v1644_v26 = vpack.c.bf16 %v2469_v43, %v2468_v54  ;;  %v1720_v49 = vadd.s32 %v1719_v27, %v1717_v24  ;;  %v1705_v17 = vadd.s32 %v1704_v34, %v1702_v25  ;;  %2701 = vmatprep.mubr.msk.bf16.mxu0 %vm557_vm0, %v2805_v41  ;;  %v1396_v44 = vcvt.f32.s32 %v3627_v9  ;;  %s2250_s24 = sshll.u32 %s3873_s20, 4  ;;  %s3905_s24 = int_to_ptr.vmem [resolvable:$true] %s2250_s24 }
 0x46d   : > { %v1364_v5 = vpop.xlane.xlu0 %1363  ;;  %v1349_v59 = vpop.xlane.xlu1 %1348  ;;  %v1381_v13 = vcvt.f32.s32 %v3629_v10  ;;  %s2807_s1 = scalar_lea.vmem %s3905_s24, 512  ;;  %p2814_p0 = scmp.lt.s32.totalorder %s3905_s24, %s2812_s3 }
 0x46e   : > { %vm1812_vm8 = vcmp.eq.s32.totalorder %v4079_v42, %v1720_v49  ;;  %vm1811_vm9 = vcmp.eq.s32.totalorder %v4079_v42, %v1705_v17  ;;  %v1365_v55 = vcvt.f32.s32 %v1364_v5  ;;  %v1350_v61 = vcvt.f32.s32 %v1349_v59  ;;  %1855 = vrot.lane.b32.xlu1 %v1644_v26, %s4081_s22  ;;  %p2808_p11 = scmp.ne.s32.totalorder %s3905_s24, %s2807_s1 }
 0x46f   : > { %v2477_v40 = vsel %vm1812_vm8, 1.0, %v2902_v21  ;;  %v2476_v53 = vsel %vm1811_vm9, 1.0, %v2902_v21  ;;  %v1397_v17 = vshll.u32 %v1396_v44, 16  ;;  %v1382_v10 = vshll.u32 %v1381_v13, 16 }
 0x470   : > { %v1835_v56 = vpack.c.bf16 %v2477_v40, %v2476_v53  ;;  %v1368_v58 = vadd.s32 %v1367_v38, %v1365_v55  ;;  %v1353_v12 = vadd.s32 %v1352_v63, %v1350_v61  ;;  %v1587_v38 = vcvt.f32.s32 %v3637_v14  ;;  %p2809_p12 = pnand %p2808_p11, %p3016_p5 }
 0x471   : > { %v1555_v45 = vpop.xlane.xlu0 %1554  ;;  %v1540_v62 = vpop.xlane.xlu1 %1539  ;;  %v1572_v63 = vcvt.f32.s32 %v3639_v15 }
 0x472   : > { %vm1432_vm10 = vcmp.eq.s32.totalorder %v4079_v42, %v1368_v58  ;;  %vm1431_vm11 = vcmp.eq.s32.totalorder %v4079_v42, %v1353_v12  ;;  %v1556_v30 = vcvt.f32.s32 %v1555_v45  ;;  %v1541_v51 = vcvt.f32.s32 %v1540_v62  ;;  %1867 = vrot.lane.b32.xlu1 %v1835_v56, %s4082_s0  ;;  %p2810_p13 = pneg %p2809_p12 }
 0x473   : > { %v2463_v39 = vsel %vm1432_vm10, 1.0, %v2902_v21  ;;  %v2462_v1 = vsel %vm1431_vm11, 1.0, %v2902_v21  ;;  %2702 = vmatmul.mubr.msk.bf16.gmra.mxu0 %vm557_vm0, %v2806_v3  ;;  %v1588_v53 = vshll.u32 %v1587_v38, 16  ;;  %v1573_v56 = vshll.u32 %v1572_v63, 16 }
 0x474   : > { %v1454_v22 = vpack.c.bf16 %v2463_v39, %v2462_v1  ;;  %v1559_v27 = vadd.s32 %v1558_v7, %v1556_v30  ;;  %v1544_v34 = vadd.s32 %v1543_v46, %v1541_v51  ;;  %v1778_v58 = vcvt.f32.s32 %v3647_v8 }
 0x475   : > { %v1746_v20 = vpop.xlane.xlu0 %1745  ;;  %v1731_v36 = vpop.xlane.xlu1 %1730  ;;  %v1763_v12 = vcvt.f32.s32 %v3649_v0  ;;  %v1426_v0 = vcvt.f32.s32 %v3657_v29  ;;  %v1411_v1 = vcvt.f32.s32 %v3659_v28  ;;  %v1617_v28 = vcvt.f32.s32 %v3667_v47 }
 0x476   : > { %vm1623_vm12 = vcmp.eq.s32.totalorder %v4079_v42, %v1559_v27  ;;  %vm1622_vm13 = vcmp.eq.s32.totalorder %v4079_v42, %v1544_v34  ;;  %v1747_v24 = vcvt.f32.s32 %v1746_v20  ;;  %v1732_v25 = vcvt.f32.s32 %v1731_v36  ;;  %1845 = vrot.lane.b32.xlu0 %v1454_v22, %s4080_s27 }
 0x477   : > { %v2471_v43 = vsel %vm1623_vm12, 1.0, %v2902_v21  ;;  %v2470_v54 = vsel %vm1622_vm13, 1.0, %v2902_v21  ;;  %v1779_v8 = vshll.u32 %v1778_v58, 16  ;;  %v1764_v39 = vshll.u32 %v1763_v12, 16 }
 0x478   : > { %v1645_v26 = vpack.c.bf16 %v2471_v43, %v2470_v54  ;;  %v1750_v49 = vadd.s32 %v1749_v18, %v1747_v24  ;;  %v1735_v9 = vadd.s32 %v1734_v19, %v1732_v25  ;;  %v1427_v29 = vshll.u32 %v1426_v0, 16 }
 0x479   : > { %v1394_v4 = vpop.xlane.xlu0 %1393  ;;  %v1379_v52 = vpop.xlane.xlu1 %1378  ;;  %v1412_v36 = vshll.u32 %v1411_v1, 16  ;;  %v1602_v24 = vcvt.f32.s32 %v3669_v48  ;;  %v1618_v47 = vshll.u32 %v1617_v28, 16  ;;  %v1808_v48 = vcvt.f32.s32 %v3677_v50 }
 0x47a   : > { %vm1814_vm14 = vcmp.eq.s32.totalorder %v4079_v42, %v1750_v49  ;;  %vm1813_vm15 = vcmp.eq.s32.totalorder %v4079_v42, %v1735_v9  ;;  %v1395_v5 = vcvt.f32.s32 %v1394_v4  ;;  %v1380_v59 = vcvt.f32.s32 %v1379_v52  ;;  %1857 = vrot.lane.b32.xlu1 %v1645_v26, %s4081_s22 }
 0x47b   : > { %v2479_v55 = vsel %vm1814_vm14, 1.0, %v2902_v21  ;;  %v2478_v61 = vsel %vm1813_vm15, 1.0, %v2902_v21  ;;  %v1603_v63 = vshll.u32 %v1602_v24, 16  ;;  %v1793_v4 = vcvt.f32.s32 %v3679_v60 }
 0x47c   : > { %v1836_v14 = vpack.c.bf16 %v2479_v55, %v2478_v61  ;;  %v1398_v40 = vadd.s32 %v1397_v17, %v1395_v5  ;;  %v1383_v15 = vadd.s32 %v1382_v10, %v1380_v59  ;;  %v1809_v50 = vshll.u32 %v1808_v48, 16 }
 0x47d   : > { %v1585_v7 = vpop.xlane.xlu0 %1584  ;;  %v1570_v46 = vpop.xlane.xlu1 %1569 }
 0x47e   : > { %vm1434_vm1 = vcmp.eq.s32.totalorder %v4079_v42, %v1398_v40  ;;  %vm1433_vm2 = vcmp.eq.s32.totalorder %v4079_v42, %v1383_v15  ;;  %v1586_v16 = vcvt.f32.s32 %v1585_v7  ;;  %v1571_v35 = vcvt.f32.s32 %v1570_v46  ;;  %1869 = vrot.lane.b32.xlu0 %v1836_v14, %s4082_s0 }
 0x47f   : > { %v2465_v45 = vsel %vm1434_vm1, 1.0, %v2902_v21  ;;  %v2464_v62 = vsel %vm1433_vm2, 1.0, %v2902_v21 }
 0x480   : > { %v1455_v30 = vpack.c.bf16 %v2465_v45, %v2464_v62  ;;  %v1589_v51 = vadd.s32 %v1588_v53, %v1586_v16  ;;  %v1574_v57 = vadd.s32 %v1573_v56, %v1571_v35  ;;  %v1794_v53 = vshll.u32 %v1793_v4, 16 }
 0x481   : > { %v1776_v41 = vpop.xlane.xlu0 %1775  ;;  %v1761_v22 = vpop.xlane.xlu1 %1760  ;;  %v1145_v16 = vcvt.f32.s32 %v3687_v11  ;;  %v1160_v11 = vcvt.f32.s32 %v3697_v2 }
 0x482   : > { %vm1625_vm4 = vcmp.eq.s32.totalorder %v4079_v42, %v1589_v51  ;;  %vm1624_vm7 = vcmp.eq.s32.totalorder %v4079_v42, %v1574_v57  ;;  %v1777_v27 = vcvt.f32.s32 %v1776_v41  ;;  %v1762_v34 = vcvt.f32.s32 %v1761_v22  ;;  %1847 = vrot.lane.b32.xlu1 %v1455_v30, %s4080_s27 }
 0x483   : > { %v2473_v18 = vsel %vm1625_vm4, 1.0, %v2902_v21  ;;  %v2472_v19 = vsel %vm1624_vm7, 1.0, %v2902_v21  ;;  %v1130_v30 = vcvt.f32.s32 %v3691_v23 }
 0x484   : > { %v1646_v44 = vpack.c.bf16 %v2473_v18, %v2472_v19  ;;  %v1780_v13 = vadd.s32 %v1779_v8, %v1777_v27  ;;  %v1765_v20 = vadd.s32 %v1764_v39, %v1762_v34  ;;  %v1146_v39 = vshll.u32 %v1145_v16, 16 }
 0x485   : > { %v1424_v25 = vpop.xlane.xlu0 %1423  ;;  %v1409_v43 = vpop.xlane.xlu1 %1408  ;;  %v1131_v27 = vshll.u32 %v1130_v30, 16  ;;  %v1175_v34 = vcvt.f32.s32 %v3700_v33  ;;  %v1161_v19 = vshll.u32 %v1160_v11, 16  ;;  %v1235_v30 = vcvt.f32.s32 %v3719_v31 }
 0x486   : > { %vm1816_vm3 = vcmp.eq.s32.totalorder %v4079_v42, %v1780_v13  ;;  %vm1815_vm5 = vcmp.eq.s32.totalorder %v4079_v42, %v1765_v20  ;;  %v1425_v54 = vcvt.f32.s32 %v1424_v25  ;;  %v1410_v26 = vcvt.f32.s32 %v1409_v43  ;;  %1859 = vrot.lane.b32.xlu1 %v1646_v44, %s4081_s22 }
 0x487   : > { %v2481_v49 = vsel %vm1816_vm3, 1.0, %v2902_v21  ;;  %v2480_v9 = vsel %vm1815_vm5, 1.0, %v2902_v21  ;;  %v1176_v13 = vshll.u32 %v1175_v34, 16  ;;  %v1190_v20 = vcvt.f32.s32 %v3707_v32 }
 0x488   : > { %v1837_v17 = vpack.c.bf16 %v2481_v49, %v2480_v9  ;;  %v1428_v10 = vadd.s32 %v1427_v29, %v1425_v54  ;;  %v1413_v38 = vadd.s32 %v1412_v36, %v1410_v26  ;;  %v1205_v36 = vcvt.f32.s32 %v3711_v37 }
 0x489   : > { %v1615_v52 = vpop.xlane.xlu0 %1614  ;;  %v1600_v5 = vpop.xlane.xlu1 %1599  ;;  %v1191_v49 = vshll.u32 %v1190_v20, 16  ;;  %vm1895_vm3 = vcmask 785408  }
 0x48a   : > { %vm1436_vm8 = vcmp.eq.s32.totalorder %v4079_v42, %v1428_v10  ;;  %vm1435_vm9 = vcmp.eq.s32.totalorder %v4079_v42, %v1413_v38  ;;  %v1616_v59 = vcvt.f32.s32 %v1615_v52  ;;  %v1601_v3 = vcvt.f32.s32 %v1600_v5  ;;  %1871 = vrot.lane.b32.xlu1 %v1837_v17, %s4082_s0 }
 0x48b   : > { %v2467_v55 = vsel %vm1436_vm8, 1.0, %v2902_v21  ;;  %v2466_v61 = vsel %vm1435_vm9, 1.0, %v2902_v21  ;;  %v1206_v17 = vshll.u32 %v1205_v36, 16 }
 0x48c   : > { %v1456_v14 = vpack.c.bf16 %v2467_v55, %v2466_v61  ;;  %v1619_v40 = vadd.s32 %v1618_v47, %v1616_v59  ;;  %v1604_v15 = vadd.s32 %v1603_v63, %v1601_v3 }
 0x48d   : > { %v1806_v60 = vpop.xlane.xlu0 %1805  ;;  %v1791_v56 = vpop.xlane.xlu1 %1790 }
 0x48e   : > { %vm1627_vm10 = vcmp.eq.s32.totalorder %v4079_v42, %v1619_v40  ;;  %vm1626_vm11 = vcmp.eq.s32.totalorder %v4079_v42, %v1604_v15  ;;  %v1807_v58 = vcvt.f32.s32 %v1806_v60  ;;  %v1792_v12 = vcvt.f32.s32 %v1791_v56  ;;  %1849 = vrot.lane.b32.xlu0 %v1456_v14, %s4080_s27 }
 0x48f   : > { %v2475_v7 = vsel %vm1627_vm10, 1.0, %v2902_v21  ;;  %v2474_v46 = vsel %vm1626_vm11, 1.0, %v2902_v21 }
 0x490   : > { %v1647_v35 = vpack.c.bf16 %v2475_v7, %v2474_v46  ;;  %v1810_v45 = vadd.s32 %v1809_v50, %v1807_v58  ;;  %v1795_v62 = vadd.s32 %v1794_v53, %v1792_v12 }
 0x492   : > { %vm1818_vm12 = vcmp.eq.s32.totalorder %v4079_v42, %v1810_v45  ;;  %vm1817_vm13 = vcmp.eq.s32.totalorder %v4079_v42, %v1795_v62  ;;  %1861 = vrot.lane.b32.xlu0 %v1647_v35, %s4081_s22 }
 0x493   : > { %v2483_v51 = vsel %vm1818_vm12, 1.0, %v2902_v21  ;;  %v2482_v57 = vsel %vm1817_vm13, 1.0, %v2902_v21  ;;  %v1143_v8 = vpop.xlane.xlu0 %1142 }
 0x494   : > { %v1838_v0 = vpack.c.bf16 %v2483_v51, %v2482_v57  ;;  %v1144_v1 = vcvt.f32.s32 %v1143_v8  ;;  %v1220_v51 = vcvt.f32.s32 %v3717_v6 }
 0x496   : > { %v1147_v41 = vadd.s32 %v1146_v39, %v1144_v1  ;;  %1873 = vrot.lane.b32.xlu0 %v1838_v0, %s4082_s0  ;;  %v1128_v22 = vpop.xlane.xlu1 %1127  ;;  %v1236_v0 = vshll.u32 %v1235_v30, 16  ;;  %v1221_v1 = vshll.u32 %v1220_v51, 16 }
 0x497   : > { %v1129_v18 = vcvt.f32.s32 %v1128_v22 }
 0x498   : > { %vm1239_vm14 = vcmp.eq.s32.totalorder %v4079_v42, %v1147_v41 }
 0x499   : > { %v1132_v23 = vadd.s32 %v1131_v27, %v1129_v18  ;;  %v2453_v28 = vsel %vm1239_vm14, 1.0, %v2902_v21 }
 0x49a   : > { %v1158_v44 = vpop.xlane.xlu1 %1157 }
 0x49b   : > { %vm1238_vm15 = vcmp.eq.s32.totalorder %v4079_v42, %v1132_v23  ;;  %v1173_v29 = vpop.xlane.xlu0 %1172  ;;  %v1159_v2 = vcvt.f32.s32 %v1158_v44 }
 0x49c   : > { %v2452_v24 = vsel %vm1238_vm15, 1.0, %v2902_v21  ;;  %v1174_v33 = vcvt.f32.s32 %v1173_v29 }
 0x49d   : > { %v1162_v25 = vadd.s32 %v1161_v19, %v1159_v2  ;;  %v1262_v43 = vpack.c.bf16 %v2453_v28, %v2452_v24 }
 0x49e   : > { %v1177_v54 = vadd.s32 %v1176_v13, %v1174_v33  ;;  %v1188_v26 = vpop.xlane.xlu1 %1187 }
 0x49f   : > { %vm1240_vm1 = vcmp.eq.s32.totalorder %v4079_v42, %v1162_v25  ;;  %v1203_v9 = vpop.xlane.xlu0 %1202  ;;  %v1189_v32 = vcvt.f32.s32 %v1188_v26 }
 0x4a0   : > { %vm1241_vm2 = vcmp.eq.s32.totalorder %v4079_v42, %v1177_v54  ;;  %v2454_v37 = vsel %vm1240_vm1, 1.0, %v2902_v21  ;;  %v1204_v10 = vcvt.f32.s32 %v1203_v9 }
 0x4a1   : > { %v2455_v38 = vsel %vm1241_vm2, 1.0, %v2902_v21  ;;  %v1192_v47 = vadd.s32 %v1191_v49, %v1189_v32 }
 0x4a2   : > { %v1207_v63 = vadd.s32 %v1206_v17, %v1204_v10  ;;  %v1263_v48 = vpack.c.bf16 %v2455_v38, %v2454_v37  ;;  %v1218_v59 = vpop.xlane.xlu1 %1217 }
 0x4a3   : > { %vm1242_vm4 = vcmp.eq.s32.totalorder %v4079_v42, %v1192_v47  ;;  %v1233_v60 = vpop.xlane.xlu0 %1232  ;;  %v1219_v8 = vcvt.f32.s32 %v1218_v59 }
 0x4a4   : > { %vm1243_vm7 = vcmp.eq.s32.totalorder %v4079_v42, %v1207_v63  ;;  %v2456_v4 = vsel %vm1242_vm4, 1.0, %v2902_v21  ;;  %v1234_v57 = vcvt.f32.s32 %v1233_v60 }
 0x4a5   : > { %v2457_v52 = vsel %vm1243_vm7, 1.0, %v2902_v21  ;;  %v1222_v41 = vadd.s32 %v1221_v1, %v1219_v8 }
 0x4a6   : > { %v1264_v5 = vpack.c.bf16 %v2457_v52, %v2456_v4  ;;  %v1237_v11 = vadd.s32 %v1236_v0, %v1234_v57 }
 0x4a7   : > { %vm1244_vm8 = vcmp.eq.s32.totalorder %v4079_v42, %v1222_v41 }
 0x4a8   : > { %vm1245_vm5 = vcmp.eq.s32.totalorder %v4079_v42, %v1237_v11  ;;  %v2458_v44 = vsel %vm1244_vm8, 1.0, %v2902_v21 }
 0x4a9   : > { %v2459_v19 = vsel %vm1245_vm5, 1.0, %v2902_v21 }
 0x4aa   : > { %v1265_v20 = vpack.c.bf16 %v2459_v19, %v2458_v44 }
 0x4dc   : > { %v1844_v3 = vpop.permute.xlu1 %1843 }
 0x4dd   : > { %v1877_v61 = vsel %vm1077_vm6, %v1262_v43, %v1844_v3 }
 0x4e0   : > { %v1856_v55 = vpop.permute.xlu1 %1855 }
 0x4e1   : > { %v1888_v14 = vsel %vm557_vm0, %v1877_v61, %v1856_v55 }
 0x4e4   : > { %v1868_v40 = vpop.permute.xlu1 %1867 }
 0x4e5   : > { %v1897_v15 = vsel %vm1895_vm3, %v1888_v14, %v1868_v40 }
 0x4e6   : > { %v2484_v50 = vcombine.low %v1897_v15, %v1897_v15  ;;  %v2485_v53 = vcombine.high %v1897_v15, %v1897_v15  ;;  %2721 = vmatprep.mubr.bf16.mxu1 %v1897_v15 }
 0x4e8   : > { %1936 = vst [vmem:[%s3873_s20] sm:$0xf] %v2484_v50  ;;  %1937 = vst [vmem:[%s3873_s20 + $0x4] sm:$0xf] %v2485_v53  ;;  %v1846_v56 = vpop.permute.xlu0 %1845 }
 0x4e9   : > { %v1880_v12 = vsel %vm1077_vm6, %v1263_v48, %v1846_v56 }
 0x4ec   : > { %v1858_v58 = vpop.permute.xlu1 %1857 }
 0x4ed   : > { %v1890_v7 = vsel %vm557_vm0, %v1880_v12, %v1858_v58 }
 0x4f0   : > { %v1870_v46 = vpop.permute.xlu0 %1869 }
 0x4f1   : > { %v1900_v16 = vsel %vm1895_vm3, %v1890_v7, %v1870_v46 }
 0x4f2   : > { %v2486_v35 = vcombine.low %v1900_v16, %v1900_v16  ;;  %v2487_v45 = vcombine.high %v1900_v16, %v1900_v16  ;;  %2722 = vmatmul.mubr.bf16.vlgmr.msra.gmra.mxu1 %v1900_v16 }
 0x4f4   : > { %1938 = vst [vmem:[%s3873_s20 + $0x8] sm:$0xf] %v2486_v35  ;;  %1939 = vst [vmem:[%s3873_s20 + $0xc] sm:$0xf] %v2487_v45  ;;  %v1848_v62 = vpop.permute.xlu1 %1847 }
 0x4f5   : > { %v1883_v22 = vsel %vm1077_vm6, %v1264_v5, %v1848_v62 }
 0x4f8   : > { %v1860_v39 = vpop.permute.xlu1 %1859 }
 0x4f9   : > { %v1892_v27 = vsel %vm557_vm0, %v1883_v22, %v1860_v39 }
 0x4fc   : > { %v1872_v34 = vpop.permute.xlu1 %1871 }
 0x4fd   : > { %v1903_v18 = vsel %vm1895_vm3, %v1892_v27, %v1872_v34 }
 0x4fe   : > { %v2488_v23 = vcombine.low %v1903_v18, %v1903_v18  ;;  %v2489_v31 = vcombine.high %v1903_v18, %v1903_v18  ;;  %2725 = vmatprep.mubr.bf16.mxu1 %v1903_v18 }
 0x500   : > { %1940 = vst [vmem:[%s3873_s20 + $0x10] sm:$0xf] %v2488_v23  ;;  %1941 = vst [vmem:[%s3873_s20 + $0x14] sm:$0xf] %v2489_v31  ;;  %v1850_v6 = vpop.permute.xlu0 %1849 }
 0x501   : > { %v1886_v29 = vsel %vm1077_vm6, %v1265_v20, %v1850_v6 }
 0x504   : > { %v1862_v13 = vpop.permute.xlu0 %1861 }
 0x505   : > { %v1894_v2 = vsel %vm557_vm0, %v1886_v29, %v1862_v13 }
 0x508   : > { %v1874_v42 = vpop.permute.xlu0 %1873 }
 0x509   : > { %v1906_v36 = vsel %vm1895_vm3, %v1894_v2, %v1874_v42 }
 0x50a   : > { %v2490_v28 = vcombine.low %v1906_v36, %v1906_v36  ;;  %v2491_v24 = vcombine.high %v1906_v36, %v1906_v36  ;;  %2726 = vmatmul.mubr.bf16.gmra.mxu1 %v1906_v36 }
 0x50c   : > { %1942 = vst [vmem:[%s3873_s20 + $0x18] sm:$0xf] %v2490_v28  ;;  %1943 = vst [vmem:[%s3873_s20 + $0x1c] sm:$0xf] %v2491_v24  ;;  %s2813_s20 = scalar_lea.vmem %s2812_s3, 1024 }
 0x50d   : > { %p2815_p1 = scmp.lt.s32.totalorder %s2813_s20, %s2807_s1 }
 0x50f   : > { %p2816_p2 = por %p2815_p1, %p2814_p0 }
 0x511   : > { %p2817_p3 = pnand %p2816_p2, %p2810_p13 }
 0x513   : > { %2820 = shalt.err (!%p2817_p3)
}
 0x514   : > { %s2821_s21 = scalar_lea.hbm %s3903_s30, 512  ;;  %s2825_s2 = scalar_lea.hbm %s4019_s11, 1024 }
 0x515   : > { %p2822_p4 = scmp.ne.s32.totalorder %s3903_s30, %s2821_s21  ;;  %p2826_p9 = scmp.lt.s32.totalorder %s3903_s30, %s4019_s11 }
 0x516   : > { %p2827_p10 = scmp.lt.s32.totalorder %s2825_s2, %s2821_s21 }
 0x517   : > { %p2823_p7 = pnand %p2822_p4, %p3016_p5 }
 0x518   : > { %p2828_p11 = por %p2827_p10, %p2826_p9 }
 0x519   : > { %p2824_p8 = pneg %p2823_p7 }
 0x51b   : > { %p2829_p12 = pnand %p2828_p11, %p2824_p8 }
 0x51d   : > { %2832 = shalt.err (!%p2829_p12)
}
 0x51e   : > { %s2904_s1 = smov 4   ;;  %s4083_s3 = scalar_lea.sflag [#allocation3], %s3121_s17 }
 0x51f   : > { %2729 = dma.vmem_to_hbm [thread:$0]  (%p3016_p5), %s3905_s24, 512, %s3903_s30, %s4083_s3, %s4081_s22, %s4081_s22, %s2904_s1  }
 0x520   : > { %s4084_s0 = sshll.u32 %s2999_s29, 10  ;;  %s2266_s27 = sshll.u32 %s3129_s16, 4  ;;  %s3941_s27 = int_to_ptr.vmem [resolvable:$true] %s2266_s27 }
 0x521   : > { %s3938_s21 = scalar_lea.hbm %s4020_s12, %s4084_s0  ;;  %s2232_s14 = scalar_lea.sflag [#allocation5], %s3121_s17 }
 0x522   : > { %s2833_s2 = scalar_lea.vmem %s3941_s27, 1024  ;;  %s2905_s4 = smov [#allocation4]  }
 0x523   : > { %p2834_p13 = scmp.ne.s32.totalorder %s3941_s27, %s2833_s2  ;;  %s2837_s22 = sshll.u32 %s2905_s4, 4  ;;  %s2838_s22 = int_to_ptr.vmem [resolvable:$false] %s2837_s22 }
 0x524   : > { %s2839_s29 = scalar_lea.vmem %s2838_s22, 2048  ;;  %p2840_p2 = scmp.lt.s32.totalorder %s3941_s27, %s2838_s22 }
 0x525   : > { %p2835_p0 = pnand %p2834_p13, %p3016_p5  ;;  %p2841_p3 = scmp.lt.s32.totalorder %s2839_s29, %s2833_s2 }
 0x527   : > { %p2836_p1 = pneg %p2835_p0  ;;  %p2842_p4 = por %p2841_p3, %p2840_p2 }
 0x529   : > { %p2843_p7 = pnand %p2842_p4, %p2836_p1 }
 0x52b   : > { %2846 = shalt.err (!%p2843_p7)
}
 0x52c   : > { %s2847_s16 = scalar_lea.hbm %s3938_s21, 1024  ;;  %s2851_s4 = scalar_lea.hbm %s4020_s12, 2048 }
 0x52d   : > { %p2848_p8 = scmp.ne.s32.totalorder %s3938_s21, %s2847_s16  ;;  %p2852_p11 = scmp.lt.s32.totalorder %s3938_s21, %s4020_s12 }
 0x52e   : > { %p2853_p12 = scmp.lt.s32.totalorder %s2851_s4, %s2847_s16 }
 0x52f   : > { %p2849_p9 = pnand %p2848_p8, %p3016_p5 }
 0x530   : > { %p2854_p13 = por %p2853_p12, %p2852_p11 }
 0x531   : > { %p2850_p10 = pneg %p2849_p9 }
 0x533   : > { %p2855_p0 = pnand %p2854_p13, %p2850_p10 }
 0x535   : > { %2858 = shalt.err (!%p2855_p0)
}
 0x536   : > { %s2906_s0 = smov 128   ;;  %s2907_s15 = smov 8   ;;  %v2699_v21 = vpop.f32.mrf.mxu0  ;;  %v2492_v25 = vld [vmem:[%s4017_s9] ss:$0 sm:$0xff]  ;;  %vm2217_vm0 = vcmask 519168  }
 0x537   : > { %2730 = dma.vmem_to_hbm [thread:$0]  (%p3016_p5), %s3941_s27, 1024, %s3938_s21, %s2232_s14, %s2906_s0, %s2906_s0, %s2907_s15   ;;  %v2026_v54 = vadd.f32 %v2699_v21, %v2492_v25 }
 0x538   : > { %v2017_v33 = vpop.f32.mrf.mxu0  ;;  %s3973_s16 = scalar_lea.vmem %s4021_s13, %s3042_s23 }
 0x539   : > { %v2018_v26 = vadd.f32 %v2492_v25, %v2017_v33 }
 0x53a   : > { %v2700_v43 = vpop.f32.mrf.mxu0 }
 0x53b   : > { %v2029_v17 = vadd.f32 %v2700_v43, %v2492_v25 }
 0x53c   : > { %v2020_v9 = vpop.f32.mrf.mxu0 }
 0x53d   : > { %v2021_v47 = vadd.f32 %v2492_v25, %v2020_v9 }
 0x53e   : > { %v2703_v55 = vpop.f32.mrf.mxu0 }
 0x53f   : > { %v2042_v14 = vadd.f32 %v2703_v55, %v2492_v25 }
 0x540   : > { %v2033_v61 = vpop.f32.mrf.mxu0 }
 0x541   : > { %v2034_v50 = vadd.f32 %v2492_v25, %v2033_v61 }
 0x542   : > { %v2704_v40 = vpop.f32.mrf.mxu0 }
 0x543   : > { %v2045_v58 = vadd.f32 %v2704_v40, %v2492_v25 }
 0x544   : > { %v2036_v60 = vpop.f32.mrf.mxu0 }
 0x545   : > { %v2037_v16 = vadd.f32 %v2492_v25, %v2036_v60 }
 0x5b2   : > { %v2723_v49 = vpop.f32.mrf.mxu1 }
 0x5b3   : > { %v2179_v32 = vsub.f32 %v2026_v54, %v2723_v49 }
 0x5b4   : > { %v2146_v37 = vpop.f32.mrf.mxu1 }
 0x5b5   : > { %v2527_v10 = vpack.c.bf16 %v2179_v32, %v2179_v32  ;;  %v2177_v38 = vsub.f32 %v2018_v26, %v2146_v37 }
 0x5b6   : > { %v2724_v63 = vpop.f32.mrf.mxu1 }
 0x5b7   : > { %2220 = vst.msk [vmem:[%s3973_s16 + $0x8] sm:$0xf] %vm2217_vm0, %v2527_v10  ;;  %v2525_v48 = vpack.c.bf16 %v2177_v38, %v2177_v38  ;;  %v2180_v4 = vsub.f32 %v2029_v17, %v2724_v63 }
 0x5b8   : > { %v2149_v52 = vpop.f32.mrf.mxu1 }
 0x5b9   : > { %2218 = vst.msk [vmem:[%s3973_s16] sm:$0xf] %vm2217_vm0, %v2525_v48  ;;  %v2528_v5 = vpack.c.bf16 %v2180_v4, %v2180_v4  ;;  %v2178_v59 = vsub.f32 %v2021_v47, %v2149_v52 }
 0x5bb   : > { %2221 = vst.msk [vmem:[%s3973_s16 + $0xc] sm:$0xf] %vm2217_vm0, %v2528_v5  ;;  %v2526_v3 = vpack.c.bf16 %v2178_v59, %v2178_v59 }
 0x5bd   : > { %2219 = vst.msk [vmem:[%s3973_s16 + $0x4] sm:$0xf] %vm2217_vm0, %v2526_v3 }
 0x5ca   : > { %v2727_v15 = vpop.f32.mrf.mxu1 }
 0x5cb   : > { %v2183_v53 = vsub.f32 %v2042_v14, %v2727_v15 }
 0x5cc   : > { %v2162_v56 = vpop.f32.mrf.mxu1 }
 0x5cd   : > { %v2531_v12 = vpack.c.bf16 %v2183_v53, %v2183_v53  ;;  %v2181_v7 = vsub.f32 %v2034_v50, %v2162_v56 }
 0x5ce   : > { %v2728_v46 = vpop.f32.mrf.mxu1 }
 0x5cf   : > { %2224 = vst.msk [vmem:[%s3973_s16 + $0x18] sm:$0xf] %vm2217_vm0, %v2531_v12  ;;  %v2529_v35 = vpack.c.bf16 %v2181_v7, %v2181_v7  ;;  %v2184_v45 = vsub.f32 %v2045_v58, %v2728_v46 }
 0x5d0   : > { %v2165_v62 = vpop.f32.mrf.mxu1 }
 0x5d1   : > { %2222 = vst.msk [vmem:[%s3973_s16 + $0x10] sm:$0xf] %vm2217_vm0, %v2529_v35  ;;  %v2532_v30 = vpack.c.bf16 %v2184_v45, %v2184_v45  ;;  %v2182_v51 = vsub.f32 %v2037_v16, %v2165_v62 }
 0x5d3   : > { %2225 = vst.msk [vmem:[%s3973_s16 + $0x1c] sm:$0xf] %vm2217_vm0, %v2532_v30  ;;  %v2530_v57 = vpack.c.bf16 %v2182_v51, %v2182_v51 }
 0x5d5   : > { %2223 = vst.msk [vmem:[%s3973_s16 + $0x14] sm:$0xf] %vm2217_vm0, %v2530_v57 }
 0x5d6 PF: > { %p2740_p5 = scmp.ge.s32.totalorder %s2897_s28, 2  ;;  %s2285_s18 = sand.u32 1, %s2885_s25  }
 0x5d7   : > { %s2286_s23 = scalar_lea.sflag [#allocation3], %s2285_s18 }
 0x5d8   : > { %p2734_p1 = pnand %p2740_p5, %p3020_p6 }
 0x5da   : > { %p2735_p2 = pneg %p2734_p1 }
 0x5dc   : > { %2876 = dma.done.wait (%p2735_p2), %s2286_s23, 512  }
 0x5dd   : > { %2878 = vsyncadd (%p2735_p2), %s2286_s23, 4294966784  ;;  %s2295_s17 = scalar_lea.sflag [#allocation5], %s2285_s18 }
 0x5de   : > { %2880 = dma.done.wait (%p2735_p2), %s2295_s17, 1024  }
 0x5df   : > { %2882 = vsyncadd (%p2735_p2), %s2295_s17, 4294966272  ;;  %s4085_s28 = sld [smem:[#allocation9_spill]]  ;;  %s4088_s25 = smov %s2889_s26 }
 0x5e0   : > { %s4086_s21 = sld [smem:[#allocation8_spill]] }
 0x5e1   : > { %s4087_s27 = sld [smem:[#allocation10_spill]] }
 0x5e5   : > { %p27_p3 = scmp.ge.s32.totalorder %s4085_s28, 4  }
 0x5e6   : > { %s4089_s26 = smov %s4086_s21 }
 0x5e7   :  { %29 = sbr.rel (!%p27_p3) target bundleno = 11 (0xb), region = 131 }
 0x5ec   :  { %2308 = vsyncpa [#allocation3], 1 }
 0x5ed   :  { %2310 = vsyncpa [#allocation3 + $0x1], 1 }
 0x5ee   :  { %2311 = vsyncpa [#allocation5], 1 }
 0x5ef   :  { %2313 = vsyncpa [#allocation5 + $0x1], 1 }

</bundles_post_ra>
